<compile_context>
chip_gen: v7x
topology: tpu7x:2x2x1
jax: 0.10.0
libtpu: 0.0.40
codegen_flags: <defaults>
</compile_context>

<pallas_src>
import functools

import jax
import jax.numpy as jnp
from jax.experimental import pallas as pl
from jax.experimental.pallas import tpu as pltpu

# ----------------------------- model config ---------------------------------
# (small, self-consistent shapes; reference build() uses dim=256, n_layers=12,
#  n_heads=8 -- same architecture, scaled down for this synthetic script)
DIM = 64
N_HEADS = 4
HEAD_DIM = DIM // N_HEADS
N_LAYERS = 2
VOCAB = 256
MULTIPLE_OF = 32
NORM_EPS = 1e-5
ROPE_THETA = 10000.0


def _ffn_hidden(dim: int) -> int:
    h = 4 * dim
    h = int(2 * h / 3)
    return MULTIPLE_OF * ((h + MULTIPLE_OF - 1) // MULTIPLE_OF)


HIDDEN = _ffn_hidden(DIM)  # 192 for dim=64


# --------------------------- in-kernel helpers --------------------------------
def _rmsnorm(x, w, eps):
    # x: (S, D) f32, w: (1, D) f32
    var = jnp.mean(x * x, axis=-1, keepdims=True)
    return x * jax.lax.rsqrt(var + eps) * w


# ----------------------------- fused layer kernel ------------------------------
def _layer_kernel(x_ref, cos_ref, sin_ref, anw_ref, fnw_ref,
                  wqkv_ref, wo_ref, w13_ref, w2_ref, o_ref, *, eps):
    f32, bf16 = jnp.float32, jnp.bfloat16
    x = x_ref[...]                               # (S, DIM) f32 residual stream
    S = x.shape[0]
    half = HEAD_DIM // 2

    # ---------------- attention block ----------------
    xn = _rmsnorm(x, anw_ref[...], eps)          # f32
    # fused QKV projection: bf16 operands, f32 accumulation, lane-dense (3*DIM)
    qkv = jnp.dot(xn.astype(bf16), wqkv_ref[...], preferred_element_type=f32)

    cos = cos_ref[...]                           # (S, HEAD_DIM//2) f32
    sin = sin_ref[...]

    # causal mask built in-kernel (no HBM mask input / DMA)
    row = jax.lax.broadcasted_iota(jnp.int32, (S, S), 0)
    col = jax.lax.broadcasted_iota(jnp.int32, (S, S), 1)
    causal = row >= col

    attn_proj = None
    for h in range(N_HEADS):                     # static, unrolled (tiny H)
        qlo = h * HEAD_DIM
        klo = DIM + qlo
        vlo = 2 * DIM + qlo
        # de-interleaved layout per head: [even pair comps | odd pair comps]
        qe = qkv[:, qlo:qlo + half]
        qo = qkv[:, qlo + half:qlo + HEAD_DIM]
        ke = qkv[:, klo:klo + half]
        ko = qkv[:, klo + half:klo + HEAD_DIM]
        vh = qkv[:, vlo:vlo + HEAD_DIM]
        # RoPE rotate-half (q already pre-scaled by 1/sqrt(head_dim) via wq)
        q1 = qe * cos - qo * sin
        q2 = qe * sin + qo * cos
        k1 = ke * cos - ko * sin
        k2 = ke * sin + ko * cos
        # scores: split contraction over the two halves (== rotated q . rotated k)
        s = (jnp.einsum("qd,kd->qk", q1.astype(bf16), k1.astype(bf16),
                        preferred_element_type=f32)
             + jnp.einsum("qd,kd->qk", q2.astype(bf16), k2.astype(bf16),
                          preferred_element_type=f32))
        s = jnp.where(causal, s, -1e30)
        m = jnp.max(s, axis=-1, keepdims=True)
        p = jnp.exp(s - m)                                            # f32
        p = p * pl.reciprocal(jnp.sum(p, axis=-1, keepdims=True), approx=True)
        out_h = jnp.dot(p.astype(bf16), vh.astype(bf16),
                        preferred_element_type=f32)                   # (S, hd)
        # per-head slice of Wo (leading-axis ref index), accumulate projection
        proj_h = jnp.dot(out_h.astype(bf16), wo_ref[h],
                         preferred_element_type=f32)                  # (S, DIM)
        attn_proj = proj_h if attn_proj is None else attn_proj + proj_h

    h1 = x + attn_proj                           # residual, f32

    # ---------------- SwiGLU FFN block ----------------
    hn = _rmsnorm(h1, fnw_ref[...], eps)
    h13 = jnp.dot(hn.astype(bf16), w13_ref[...],
                  preferred_element_type=f32)    # (S, 2*HIDDEN), lane-dense
    g1 = h13[:, :HIDDEN]
    g3 = h13[:, HIDDEN:]
    g = (g1 * jax.nn.sigmoid(g1)) * g3           # SiLU gate in f32 (VPU/EUP)
    o_ref[...] = h1 + jnp.dot(g.astype(bf16), w2_ref[...],
                              preferred_element_type=f32)


def llama_layer(x, cos, sin, lp, batch, seq):
    """x: (batch*seq, DIM) f32 residual stream -> same shape."""
    return pl.pallas_call(
        functools.partial(_layer_kernel, eps=NORM_EPS),
        grid=(batch,),
        in_specs=[
            pl.BlockSpec((seq, DIM), lambda b: (b, 0)),                 # x
            pl.BlockSpec((seq, HEAD_DIM // 2), lambda b: (0, 0)),       # cos
            pl.BlockSpec((seq, HEAD_DIM // 2), lambda b: (0, 0)),       # sin
            pl.BlockSpec((1, DIM), lambda b: (0, 0)),                   # attn norm w
            pl.BlockSpec((1, DIM), lambda b: (0, 0)),                   # ffn norm w
            pl.BlockSpec((DIM, 3 * DIM), lambda b: (0, 0)),             # wqkv (bf16)
            pl.BlockSpec((N_HEADS, HEAD_DIM, DIM), lambda b: (0, 0, 0)),  # wo (bf16)
            pl.BlockSpec((DIM, 2 * HIDDEN), lambda b: (0, 0)),          # w1|w3 (bf16)
            pl.BlockSpec((HIDDEN, DIM), lambda b: (0, 0)),              # w2 (bf16)
        ],
        out_specs=pl.BlockSpec((seq, DIM), lambda b: (b, 0)),
        out_shape=jax.ShapeDtypeStruct((batch * seq, DIM), jnp.float32),
        compiler_params=pltpu.CompilerParams(
            dimension_semantics=("parallel",)),
    )(x, cos, sin, lp["attn_norm"], lp["ffn_norm"],
      lp["wqkv"], lp["wo"], lp["w13"], lp["w2"])


# ------------------- final RMSNorm + output projection -------------------------
def _lm_head_kernel(x_ref, nw_ref, w_ref, o_ref, *, eps):
    xn = _rmsnorm(x_ref[...], nw_ref[...], eps)
    o_ref[...] = jnp.dot(xn.astype(jnp.bfloat16), w_ref[...],
                         preferred_element_type=jnp.float32)


def lm_head(x, norm_w, w_out, *, vocab_tile=2048):
    """x: (N, DIM) f32 -> logits (N, VOCAB) f32, vocab axis tiled."""
    N, D = x.shape
    V = w_out.shape[1]
    tv = min(vocab_tile, V)
    return pl.pallas_call(
        functools.partial(_lm_head_kernel, eps=NORM_EPS),
        grid=(pl.cdiv(V, tv),),
        in_specs=[
            pl.BlockSpec((N, D), lambda j: (0, 0)),
            pl.BlockSpec((1, D), lambda j: (0, 0)),
            pl.BlockSpec((D, tv), lambda j: (0, j)),
        ],
        out_specs=pl.BlockSpec((N, tv), lambda j: (0, j)),
        out_shape=jax.ShapeDtypeStruct((N, V), jnp.float32),
        compiler_params=pltpu.CompilerParams(
            dimension_semantics=("parallel",)),
    )(x, norm_w, w_out)


# ------------------------------ RoPE tables (glue) -----------------------------
def rope_tables(seqlen, prev_pos):
    freqs = 1.0 / (ROPE_THETA ** (jnp.arange(0, HEAD_DIM, 2, dtype=jnp.float32)
                                  / HEAD_DIM))
    t = jnp.arange(prev_pos, prev_pos + seqlen, dtype=jnp.float32)
    angles = jnp.outer(t, freqs)                 # (S, HEAD_DIM//2)
    return jnp.cos(angles), jnp.sin(angles)


# ------------------------------ forward pass -----------------------------------
def llama_forward(params, tokens, prev_pos=0, mask_l=0):
    # TODO(synk): `mask_l` semantics are not defined in the provided snippet;
    #             the standard causal mask (with prev_pos RoPE offset) is used.
    del mask_l
    B, S = tokens.shape

    # token-embedding gather stays in plain JAX (no clean tiled Pallas gather
    # needed at this size).
    h = jnp.take(params["tok_emb"], tokens, axis=0).reshape(B * S, DIM)
    cos, sin = rope_tables(S, prev_pos)

    for lp in params["layers"]:
        h = llama_layer(h, cos, sin, lp, B, S)

    logits = lm_head(h, params["final_norm"], params["output"])
    return logits.reshape(B, S, VOCAB).astype(jnp.float32)


# --------------------------- deterministic init --------------------------------
def _deinterleave_perm():
    # per head: even pair components first, then odd -> RoPE becomes a
    # contiguous rotate-half inside the kernel (no lane interleave needed).
    perm = []
    for h in range(N_HEADS):
        base = h * HEAD_DIM
        perm += [base + 2 * i for i in range(HEAD_DIM // 2)]
        perm += [base + 2 * i + 1 for i in range(HEAD_DIM // 2)]
    return jnp.asarray(perm, dtype=jnp.int32)


def init_params(key):
    keys = iter(jax.random.split(key, 4 + N_LAYERS * 16))

    def nrm(shape, std=0.02):
        return jax.random.normal(next(keys), shape, jnp.float32) * std

    perm = _deinterleave_perm()
    scale = 1.0 / (HEAD_DIM ** 0.5)

    params = {
        "tok_emb": nrm((VOCAB, DIM)),
        "final_norm": jnp.ones((1, DIM), jnp.float32),
        "output": nrm((DIM, VOCAB)).astype(jnp.bfloat16),
        "layers": [],
    }
    for _ in range(N_LAYERS):
        wq = nrm((DIM, DIM))
        wk = nrm((DIM, DIM))
        wv = nrm((DIM, DIM))
        wo = nrm((DIM, DIM))
        w1 = nrm((DIM, HIDDEN))
        w2 = nrm((HIDDEN, DIM))
        w3 = nrm((DIM, HIDDEN))
        params["layers"].append({
            "attn_norm": jnp.ones((1, DIM), jnp.float32),
            "ffn_norm": jnp.ones((1, DIM), jnp.float32),
            # fused QKV weight: q columns pre-permuted + pre-scaled by
            # 1/sqrt(head_dim); k columns pre-permuted; v untouched.  Attention
            # scores are invariant to the identical per-head permutation of q,k.
            "wqkv": jnp.concatenate(
                [wq[:, perm] * scale, wk[:, perm], wv], axis=1
            ).astype(jnp.bfloat16),
            # wo split per head (leading axis) for in-kernel per-head projection
            "wo": wo.reshape(N_HEADS, HEAD_DIM, DIM).astype(jnp.bfloat16),
            # SwiGLU up-projections fused: [w1 | w3]
            "w13": jnp.concatenate([w1, w3], axis=1).astype(jnp.bfloat16),
            "w2": w2.astype(jnp.bfloat16),
        })
    return params


# ---------------------------------- main ---------------------------------------
if __name__ == "__main__":
    key = jax.random.PRNGKey(0)
    pkey, tkey = jax.random.split(key)
    params = init_params(pkey)

    B, S = 2, 8
    prompt_tokens = jax.random.randint(tkey, (B, S), 0, VOCAB, dtype=jnp.int32)

    logits = jax.jit(llama_forward)(params, prompt_tokens)
    logits = jax.block_until_ready(logits)

    assert logits.shape == (B, S, VOCAB), logits.shape
    assert bool(jnp.all(jnp.isfinite(logits)))
    print("KERNEL_OK")
</pallas_src>

<mosaic_0001>
module attributes {stable_mosaic.version = 11 : i64} {
  func.func @_lm_head_kernel(%arg0: i32, %arg1: memref<16x64xf32, #tpu.memory_space<vmem>>, %arg2: memref<1x64xf32, #tpu.memory_space<vmem>>, %arg3: memref<64x256xbf16, #tpu.memory_space<vmem>>, %arg4: memref<16x256xf32, #tpu.memory_space<vmem>>) attributes {dimension_semantics = [#tpu.dimension_semantics<parallel>], iteration_bounds = array<i64: 1>, scalar_prefetch = 0 : i64, scratch_operands = 0 : i64, tpu.core_type = #tpu.core_type<tc>, window_params = [{pipeline_mode = #tpu.pipeline_mode<synchronous>, transform_indices = @transform_0, window_bounds = array<i64: 16, 64>}, {pipeline_mode = #tpu.pipeline_mode<synchronous>, transform_indices = @transform_1, window_bounds = array<i64: 1, 64>}, {transform_indices = @transform_2, window_bounds = array<i64: 64, 256>}, {transform_indices = @transform_3, window_bounds = array<i64: 16, 256>}]} {
    %c0 = arith.constant 0 : index
    %c0_0 = arith.constant 0 : index
    %0 = vector.load %arg1[%c0, %c0_0] : memref<16x64xf32, #tpu.memory_space<vmem>>, vector<16x64xf32>
    %c0_1 = arith.constant 0 : index
    %c0_2 = arith.constant 0 : index
    %1 = vector.load %arg2[%c0_1, %c0_2] : memref<1x64xf32, #tpu.memory_space<vmem>>, vector<1x64xf32>
    %2 = arith.mulf %0, %0 : vector<16x64xf32>
    %cst = arith.constant dense<0.000000e+00> : vector<16xf32>
    %3 = vector.multi_reduction <add>, %2, %cst [1] : vector<16x64xf32> to vector<16xf32>
    %4 = vector.shape_cast %3 : vector<16xf32> to vector<16x1xf32>
    %cst_3 = arith.constant 6.400000e+01 : f32
    %5 = vector.broadcast %cst_3 : f32 to vector<16x1xf32>
    %6 = arith.divf %4, %5 : vector<16x1xf32>
    %cst_4 = arith.constant 9.99999974E-6 : f32
    %7 = vector.broadcast %cst_4 : f32 to vector<16x1xf32>
    %8 = arith.addf %6, %7 : vector<16x1xf32>
    %9 = math.rsqrt %8 : vector<16x1xf32>
    %10 = vector.broadcast %9 : vector<16x1xf32> to vector<16x64xf32>
    %11 = arith.mulf %0, %10 : vector<16x64xf32>
    %12 = vector.broadcast %1 : vector<1x64xf32> to vector<16x64xf32>
    %13 = arith.mulf %11, %12 : vector<16x64xf32>
    %14 = arith.truncf %13 : vector<16x64xf32> to vector<16x64xbf16>
    %c0_5 = arith.constant 0 : index
    %c0_6 = arith.constant 0 : index
    %15 = vector.load %arg3[%c0_5, %c0_6] : memref<64x256xbf16, #tpu.memory_space<vmem>>, vector<64x256xbf16>
    %cst_7 = arith.constant dense<0.000000e+00> : vector<16x256xf32>
    %16 = tpu.matmul %14, %15, %cst_7 {dimension_numbers = #tpu.dot_dimension_numbers<[1], [0], [0], [1], [0, 0, 1, 1], [], []>} : vector<16x64xbf16>, vector<64x256xbf16>, vector<16x256xf32> -> vector<16x256xf32>
    %c0_8 = arith.constant 0 : index
    %c0_9 = arith.constant 0 : index
    %17 = vector.load %arg4[%c0_8, %c0_9] : memref<16x256xf32, #tpu.memory_space<vmem>>, vector<16x256xf32>
    tpu.vector_store %arg4[%c0_8, %c0_9], %16 {strides = array<i32>} : memref<16x256xf32, #tpu.memory_space<vmem>>, vector<16x256xf32>,
    return
  }
  func.func @transform_0(%arg0: i32) -> (i32, i32) {
    %c0_i32 = arith.constant 0 : i32
    %c0_i32_0 = arith.constant 0 : i32
    %c0_i32_1 = arith.constant 0 : i32
    return %c0_i32, %c0_i32_0 : i32, i32
  }
  func.func @transform_1(%arg0: i32) -> (i32, i32) {
    %c0_i32 = arith.constant 0 : i32
    %c0_i32_0 = arith.constant 0 : i32
    %c0_i32_1 = arith.constant 0 : i32
    return %c0_i32, %c0_i32_0 : i32, i32
  }
  func.func @transform_2(%arg0: i32) -> (i32, i32) {
    %c0_i32 = arith.constant 0 : i32
    %c0_i32_0 = arith.constant 0 : i32
    return %c0_i32, %arg0 : i32, i32
  }
  func.func @transform_3(%arg0: i32) -> (i32, i32) {
    %c0_i32 = arith.constant 0 : i32
    %c0_i32_0 = arith.constant 0 : i32
    return %c0_i32, %arg0 : i32, i32
  }
}

module attributes {stable_mosaic.version = 11 : i64} {
  func.func @_layer_kernel(%arg0: i32, %arg1: memref<8x64xf32, #tpu.memory_space<vmem>>, %arg2: memref<8x8xf32, #tpu.memory_space<vmem>>, %arg3: memref<8x8xf32, #tpu.memory_space<vmem>>, %arg4: memref<1x64xf32, #tpu.memory_space<vmem>>, %arg5: memref<1x64xf32, #tpu.memory_space<vmem>>, %arg6: memref<64x192xbf16, #tpu.memory_space<vmem>>, %arg7: memref<4x16x64xbf16, #tpu.memory_space<vmem>>, %arg8: memref<64x384xbf16, #tpu.memory_space<vmem>>, %arg9: memref<192x64xbf16, #tpu.memory_space<vmem>>, %arg10: memref<8x64xf32, #tpu.memory_space<vmem>>) attributes {dimension_semantics = [#tpu.dimension_semantics<parallel>], iteration_bounds = array<i64: 2>, scalar_prefetch = 0 : i64, scratch_operands = 0 : i64, tpu.core_type = #tpu.core_type<tc>, window_params = [{transform_indices = @transform_0, window_bounds = array<i64: 8, 64>}, {pipeline_mode = #tpu.pipeline_mode<synchronous>, transform_indices = @transform_1, window_bounds = array<i64: 8, 8>}, {pipeline_mode = #tpu.pipeline_mode<synchronous>, transform_indices = @transform_2, window_bounds = array<i64: 8, 8>}, {pipeline_mode = #tpu.pipeline_mode<synchronous>, transform_indices = @transform_3, window_bounds = array<i64: 1, 64>}, {pipeline_mode = #tpu.pipeline_mode<synchronous>, transform_indices = @transform_4, window_bounds = array<i64: 1, 64>}, {pipeline_mode = #tpu.pipeline_mode<synchronous>, transform_indices = @transform_5, window_bounds = array<i64: 64, 192>}, {pipeline_mode = #tpu.pipeline_mode<synchronous>, transform_indices = @transform_6, window_bounds = array<i64: 4, 16, 64>}, {pipeline_mode = #tpu.pipeline_mode<synchronous>, transform_indices = @transform_7, window_bounds = array<i64: 64, 384>}, {pipeline_mode = #tpu.pipeline_mode<synchronous>, transform_indices = @transform_8, window_bounds = array<i64: 192, 64>}, {transform_indices = @transform_9, window_bounds = array<i64: 8, 64>}]} {
    %c0 = arith.constant 0 : index
    %c0_0 = arith.constant 0 : index
    %0 = vector.load %arg1[%c0, %c0_0] : memref<8x64xf32, #tpu.memory_space<vmem>>, vector<8x64xf32>
    %c0_1 = arith.constant 0 : index
    %c0_2 = arith.constant 0 : index
    %1 = vector.load %arg4[%c0_1, %c0_2] : memref<1x64xf32, #tpu.memory_space<vmem>>, vector<1x64xf32>
    %2 = arith.mulf %0, %0 : vector<8x64xf32>
    %cst = arith.constant dense<0.000000e+00> : vector<8xf32>
    %3 = vector.multi_reduction <add>, %2, %cst [1] : vector<8x64xf32> to vector<8xf32>
    %4 = vector.shape_cast %3 : vector<8xf32> to vector<8x1xf32>
    %cst_3 = arith.constant 6.400000e+01 : f32
    %5 = vector.broadcast %cst_3 : f32 to vector<8x1xf32>
    %6 = arith.divf %4, %5 : vector<8x1xf32>
    %cst_4 = arith.constant 9.99999974E-6 : f32
    %7 = vector.broadcast %cst_4 : f32 to vector<8x1xf32>
    %8 = arith.addf %6, %7 : vector<8x1xf32>
    %9 = math.rsqrt %8 : vector<8x1xf32>
    %10 = vector.broadcast %9 : vector<8x1xf32> to vector<8x64xf32>
    %11 = arith.mulf %0, %10 : vector<8x64xf32>
    %12 = vector.broadcast %1 : vector<1x64xf32> to vector<8x64xf32>
    %13 = arith.mulf %11, %12 : vector<8x64xf32>
    %14 = arith.truncf %13 : vector<8x64xf32> to vector<8x64xbf16>
    %c0_5 = arith.constant 0 : index
    %c0_6 = arith.constant 0 : index
    %15 = vector.load %arg6[%c0_5, %c0_6] : memref<64x192xbf16, #tpu.memory_space<vmem>>, vector<64x192xbf16>
    %cst_7 = arith.constant dense<0.000000e+00> : vector<8x192xf32>
    %16 = tpu.matmul %14, %15, %cst_7 {dimension_numbers = #tpu.dot_dimension_numbers<[1], [0], [0], [1], [0, 0, 1, 1], [], []>} : vector<8x64xbf16>, vector<64x192xbf16>, vector<8x192xf32> -> vector<8x192xf32>
    %c0_8 = arith.constant 0 : index
    %c0_9 = arith.constant 0 : index
    %17 = vector.load %arg2[%c0_8, %c0_9] : memref<8x8xf32, #tpu.memory_space<vmem>>, vector<8x8xf32>
    %c0_10 = arith.constant 0 : index
    %c0_11 = arith.constant 0 : index
    %18 = vector.load %arg3[%c0_10, %c0_11] : memref<8x8xf32, #tpu.memory_space<vmem>>, vector<8x8xf32>
    %19 = tpu.iota {dimensions = array<i32: 0>} : vector<8x8xi32>
    %20 = tpu.iota {dimensions = array<i32: 1>} : vector<8x8xi32>
    %21 = arith.cmpi sge, %19, %20 : vector<8x8xi32>
    %22 = vector.extract_strided_slice %16 {offsets = [0, 0], sizes = [8, 8], strides = [1, 1]} : vector<8x192xf32> to vector<8x8xf32>
    %23 = vector.extract_strided_slice %16 {offsets = [0, 8], sizes = [8, 8], strides = [1, 1]} : vector<8x192xf32> to vector<8x8xf32>
    %24 = vector.extract_strided_slice %16 {offsets = [0, 64], sizes = [8, 8], strides = [1, 1]} : vector<8x192xf32> to vector<8x8xf32>
    %25 = vector.extract_strided_slice %16 {offsets = [0, 72], sizes = [8, 8], strides = [1, 1]} : vector<8x192xf32> to vector<8x8xf32>
    %26 = vector.extract_strided_slice %16 {offsets = [0, 128], sizes = [8, 16], strides = [1, 1]} : vector<8x192xf32> to vector<8x16xf32>
    %27 = arith.mulf %22, %17 : vector<8x8xf32>
    %28 = arith.mulf %23, %18 : vector<8x8xf32>
    %29 = arith.subf %27, %28 : vector<8x8xf32>
    %30 = arith.mulf %22, %18 : vector<8x8xf32>
    %31 = arith.mulf %23, %17 : vector<8x8xf32>
    %32 = arith.addf %30, %31 : vector<8x8xf32>
    %33 = arith.mulf %24, %17 : vector<8x8xf32>
    %34 = arith.mulf %25, %18 : vector<8x8xf32>
    %35 = arith.subf %33, %34 : vector<8x8xf32>
    %36 = arith.mulf %24, %18 : vector<8x8xf32>
    %37 = arith.mulf %25, %17 : vector<8x8xf32>
    %38 = arith.addf %36, %37 : vector<8x8xf32>
    %39 = arith.truncf %29 : vector<8x8xf32> to vector<8x8xbf16>
    %40 = arith.truncf %35 : vector<8x8xf32> to vector<8x8xbf16>
    "tpu.trace_start"() <{level = 10 : i32, message = "qd,kd->qk"}> : () -> ()
    %cst_12 = arith.constant dense<0.000000e+00> : vector<8x8xf32>
    %41 = tpu.matmul %39, %40, %cst_12 {dimension_numbers = #tpu.dot_dimension_numbers<[1], [1], [0], [0], [0, 0, 1, 0], [], []>} : vector<8x8xbf16>, vector<8x8xbf16>, vector<8x8xf32> -> vector<8x8xf32>
    "tpu.trace_stop"() : () -> ()
    %42 = arith.truncf %32 : vector<8x8xf32> to vector<8x8xbf16>
    %43 = arith.truncf %38 : vector<8x8xf32> to vector<8x8xbf16>
    "tpu.trace_start"() <{level = 10 : i32, message = "qd,kd->qk"}> : () -> ()
    %cst_13 = arith.constant dense<0.000000e+00> : vector<8x8xf32>
    %44 = tpu.matmul %42, %43, %cst_13 {dimension_numbers = #tpu.dot_dimension_numbers<[1], [1], [0], [0], [0, 0, 1, 0], [], []>} : vector<8x8xbf16>, vector<8x8xbf16>, vector<8x8xf32> -> vector<8x8xf32>
    "tpu.trace_stop"() : () -> ()
    %45 = arith.addf %41, %44 : vector<8x8xf32>
    %cst_14 = arith.constant -1.000000e+30 : f32
    %46 = vector.broadcast %cst_14 : f32 to vector<8x8xf32>
    %47 = arith.select %21, %45, %46 : vector<8x8xi1>, vector<8x8xf32>
    %cst_15 = arith.constant dense<0xFF800000> : vector<8xf32>
    %48 = vector.multi_reduction <maximumf>, %47, %cst_15 [1] : vector<8x8xf32> to vector<8xf32>
    %49 = vector.shape_cast %48 : vector<8xf32> to vector<8x1xf32>
    %50 = vector.broadcast %49 : vector<8x1xf32> to vector<8x8xf32>
    %51 = arith.subf %47, %50 : vector<8x8xf32>
    %52 = math.exp %51 : vector<8x8xf32>
    %cst_16 = arith.constant dense<0.000000e+00> : vector<8xf32>
    %53 = vector.multi_reduction <add>, %52, %cst_16 [1] : vector<8x8xf32> to vector<8xf32>
    %54 = vector.shape_cast %53 : vector<8xf32> to vector<8x1xf32>
    %55 = tpu.reciprocal %54 {approx = true} : vector<8x1xf32> -> vector<8x1xf32>
    %56 = vector.broadcast %55 : vector<8x1xf32> to vector<8x8xf32>
    %57 = arith.mulf %52, %56 : vector<8x8xf32>
    %58 = arith.truncf %57 : vector<8x8xf32> to vector<8x8xbf16>
    %59 = arith.truncf %26 : vector<8x16xf32> to vector<8x16xbf16>
    %cst_17 = arith.constant dense<0.000000e+00> : vector<8x16xf32>
    %60 = tpu.matmul %58, %59, %cst_17 {dimension_numbers = #tpu.dot_dimension_numbers<[1], [0], [0], [1], [0, 0, 1, 1], [], []>} : vector<8x8xbf16>, vector<8x16xbf16>, vector<8x16xf32> -> vector<8x16xf32>
    %61 = arith.truncf %60 : vector<8x16xf32> to vector<8x16xbf16>
    %c0_18 = arith.constant 0 : index
    %c0_19 = arith.constant 0 : index
    %c0_20 = arith.constant 0 : index
    %62 = vector.load %arg7[%c0_18, %c0_19, %c0_20] : memref<4x16x64xbf16, #tpu.memory_space<vmem>>, vector<1x16x64xbf16>
    %63 = vector.shape_cast %62 : vector<1x16x64xbf16> to vector<16x64xbf16>
    %cst_21 = arith.constant dense<0.000000e+00> : vector<8x64xf32>
    %64 = tpu.matmul %61, %63, %cst_21 {dimension_numbers = #tpu.dot_dimension_numbers<[1], [0], [0], [1], [0, 0, 1, 1], [], []>} : vector<8x16xbf16>, vector<16x64xbf16>, vector<8x64xf32> -> vector<8x64xf32>
    %65 = vector.extract_strided_slice %16 {offsets = [0, 16], sizes = [8, 8], strides = [1, 1]} : vector<8x192xf32> to vector<8x8xf32>
    %66 = vector.extract_strided_slice %16 {offsets = [0, 24], sizes = [8, 8], strides = [1, 1]} : vector<8x192xf32> to vector<8x8xf32>
    %67 = vector.extract_strided_slice %16 {offsets = [0, 80], sizes = [8, 8], strides = [1, 1]} : vector<8x192xf32> to vector<8x8xf32>
    %68 = vector.extract_strided_slice %16 {offsets = [0, 88], sizes = [8, 8], strides = [1, 1]} : vector<8x192xf32> to vector<8x8xf32>
    %69 = vector.extract_strided_slice %16 {offsets = [0, 144], sizes = [8, 16], strides = [1, 1]} : vector<8x192xf32> to vector<8x16xf32>
    %70 = arith.mulf %65, %17 : vector<8x8xf32>
    %71 = arith.mulf %66, %18 : vector<8x8xf32>
    %72 = arith.subf %70, %71 : vector<8x8xf32>
    %73 = arith.mulf %65, %18 : vector<8x8xf32>
    %74 = arith.mulf %66, %17 : vector<8x8xf32>
    %75 = arith.addf %73, %74 : vector<8x8xf32>
    %76 = arith.mulf %67, %17 : vector<8x8xf32>
    %77 = arith.mulf %68, %18 : vector<8x8xf32>
    %78 = arith.subf %76, %77 : vector<8x8xf32>
    %79 = arith.mulf %67, %18 : vector<8x8xf32>
    %80 = arith.mulf %68, %17 : vector<8x8xf32>
    %81 = arith.addf %79, %80 : vector<8x8xf32>
    %82 = arith.truncf %72 : vector<8x8xf32> to vector<8x8xbf16>
    %83 = arith.truncf %78 : vector<8x8xf32> to vector<8x8xbf16>
    "tpu.trace_start"() <{level = 10 : i32, message = "qd,kd->qk"}> : () -> ()
    %cst_22 = arith.constant dense<0.000000e+00> : vector<8x8xf32>
    %84 = tpu.matmul %82, %83, %cst_22 {dimension_numbers = #tpu.dot_dimension_numbers<[1], [1], [0], [0], [0, 0, 1, 0], [], []>} : vector<8x8xbf16>, vector<8x8xbf16>, vector<8x8xf32> -> vector<8x8xf32>
    "tpu.trace_stop"() : () -> ()
    %85 = arith.truncf %75 : vector<8x8xf32> to vector<8x8xbf16>
    %86 = arith.truncf %81 : vector<8x8xf32> to vector<8x8xbf16>
    "tpu.trace_start"() <{level = 10 : i32, message = "qd,kd->qk"}> : () -> ()
    %cst_23 = arith.constant dense<0.000000e+00> : vector<8x8xf32>
    %87 = tpu.matmul %85, %86, %cst_23 {dimension_numbers = #tpu.dot_dimension_numbers<[1], [1], [0], [0], [0, 0, 1, 0], [], []>} : vector<8x8xbf16>, vector<8x8xbf16>, vector<8x8xf32> -> vector<8x8xf32>
    "tpu.trace_stop"() : () -> ()
    %88 = arith.addf %84, %87 : vector<8x8xf32>
    %cst_24 = arith.constant -1.000000e+30 : f32
    %89 = vector.broadcast %cst_24 : f32 to vector<8x8xf32>
    %90 = arith.select %21, %88, %89 : vector<8x8xi1>, vector<8x8xf32>
    %cst_25 = arith.constant dense<0xFF800000> : vector<8xf32>
    %91 = vector.multi_reduction <maximumf>, %90, %cst_25 [1] : vector<8x8xf32> to vector<8xf32>
    %92 = vector.shape_cast %91 : vector<8xf32> to vector<8x1xf32>
    %93 = vector.broadcast %92 : vector<8x1xf32> to vector<8x8xf32>
    %94 = arith.subf %90, %93 : vector<8x8xf32>
    %95 = math.exp %94 : vector<8x8xf32>
    %cst_26 = arith.constant dense<0.000000e+00> : vector<8xf32>
    %96 = vector.multi_reduction <add>, %95, %cst_26 [1] : vector<8x8xf32> to vector<8xf32>
    %97 = vector.shape_cast %96 : vector<8xf32> to vector<8x1xf32>
    %98 = tpu.reciprocal %97 {approx = true} : vector<8x1xf32> -> vector<8x1xf32>
    %99 = vector.broadcast %98 : vector<8x1xf32> to vector<8x8xf32>
    %100 = arith.mulf %95, %99 : vector<8x8xf32>
    %101 = arith.truncf %100 : vector<8x8xf32> to vector<8x8xbf16>
    %102 = arith.truncf %69 : vector<8x16xf32> to vector<8x16xbf16>
    %cst_27 = arith.constant dense<0.000000e+00> : vector<8x16xf32>
    %103 = tpu.matmul %101, %102, %cst_27 {dimension_numbers = #tpu.dot_dimension_numbers<[1], [0], [0], [1], [0, 0, 1, 1], [], []>} : vector<8x8xbf16>, vector<8x16xbf16>, vector<8x16xf32> -> vector<8x16xf32>
    %104 = arith.truncf %103 : vector<8x16xf32> to vector<8x16xbf16>
    %c1 = arith.constant 1 : index
    %c0_28 = arith.constant 0 : index
    %c0_29 = arith.constant 0 : index
    %105 = vector.load %arg7[%c1, %c0_28, %c0_29] : memref<4x16x64xbf16, #tpu.memory_space<vmem>>, vector<1x16x64xbf16>
    %106 = vector.shape_cast %105 : vector<1x16x64xbf16> to vector<16x64xbf16>
    %cst_30 = arith.constant dense<0.000000e+00> : vector<8x64xf32>
    %107 = tpu.matmul %104, %106, %cst_30 {dimension_numbers = #tpu.dot_dimension_numbers<[1], [0], [0], [1], [0, 0, 1, 1], [], []>} : vector<8x16xbf16>, vector<16x64xbf16>, vector<8x64xf32> -> vector<8x64xf32>
    %108 = arith.addf %64, %107 : vector<8x64xf32>
    %109 = vector.extract_strided_slice %16 {offsets = [0, 32], sizes = [8, 8], strides = [1, 1]} : vector<8x192xf32> to vector<8x8xf32>
    %110 = vector.extract_strided_slice %16 {offsets = [0, 40], sizes = [8, 8], strides = [1, 1]} : vector<8x192xf32> to vector<8x8xf32>
    %111 = vector.extract_strided_slice %16 {offsets = [0, 96], sizes = [8, 8], strides = [1, 1]} : vector<8x192xf32> to vector<8x8xf32>
    %112 = vector.extract_strided_slice %16 {offsets = [0, 104], sizes = [8, 8], strides = [1, 1]} : vector<8x192xf32> to vector<8x8xf32>
    %113 = vector.extract_strided_slice %16 {offsets = [0, 160], sizes = [8, 16], strides = [1, 1]} : vector<8x192xf32> to vector<8x16xf32>
    %114 = arith.mulf %109, %17 : vector<8x8xf32>
    %115 = arith.mulf %110, %18 : vector<8x8xf32>
    %116 = arith.subf %114, %115 : vector<8x8xf32>
    %117 = arith.mulf %109, %18 : vector<8x8xf32>
    %118 = arith.mulf %110, %17 : vector<8x8xf32>
    %119 = arith.addf %117, %118 : vector<8x8xf32>
    %120 = arith.mulf %111, %17 : vector<8x8xf32>
    %121 = arith.mulf %112, %18 : vector<8x8xf32>
    %122 = arith.subf %120, %121 : vector<8x8xf32>
    %123 = arith.mulf %111, %18 : vector<8x8xf32>
    %124 = arith.mulf %112, %17 : vector<8x8xf32>
    %125 = arith.addf %123, %124 : vector<8x8xf32>
    %126 = arith.truncf %116 : vector<8x8xf32> to vector<8x8xbf16>
    %127 = arith.truncf %122 : vector<8x8xf32> to vector<8x8xbf16>
    "tpu.trace_start"() <{level = 10 : i32, message = "qd,kd->qk"}> : () -> ()
    %cst_31 = arith.constant dense<0.000000e+00> : vector<8x8xf32>
    %128 = tpu.matmul %126, %127, %cst_31 {dimension_numbers = #tpu.dot_dimension_numbers<[1], [1], [0], [0], [0, 0, 1, 0], [], []>} : vector<8x8xbf16>, vector<8x8xbf16>, vector<8x8xf32> -> vector<8x8xf32>
    "tpu.trace_stop"() : () -> ()
    %129 = arith.truncf %119 : vector<8x8xf32> to vector<8x8xbf16>
    %130 = arith.truncf %125 : vector<8x8xf32> to vector<8x8xbf16>
    "tpu.trace_start"() <{level = 10 : i32, message = "qd,kd->qk"}> : () -> ()
    %cst_32 = arith.constant dense<0.000000e+00> : vector<8x8xf32>
    %131 = tpu.matmul %129, %130, %cst_32 {dimension_numbers = #tpu.dot_dimension_numbers<[1], [1], [0], [0], [0, 0, 1, 0], [], []>} : vector<8x8xbf16>, vector<8x8xbf16>, vector<8x8xf32> -> vector<8x8xf32>
    "tpu.trace_stop"() : () -> ()
    %132 = arith.addf %128, %131 : vector<8x8xf32>
    %cst_33 = arith.constant -1.000000e+30 : f32
    %133 = vector.broadcast %cst_33 : f32 to vector<8x8xf32>
    %134 = arith.select %21, %132, %133 : vector<8x8xi1>, vector<8x8xf32>
    %cst_34 = arith.constant dense<0xFF800000> : vector<8xf32>
    %135 = vector.multi_reduction <maximumf>, %134, %cst_34 [1] : vector<8x8xf32> to vector<8xf32>
    %136 = vector.shape_cast %135 : vector<8xf32> to vector<8x1xf32>
    %137 = vector.broadcast %136 : vector<8x1xf32> to vector<8x8xf32>
    %138 = arith.subf %134, %137 : vector<8x8xf32>
    %139 = math.exp %138 : vector<8x8xf32>
    %cst_35 = arith.constant dense<0.000000e+00> : vector<8xf32>
    %140 = vector.multi_reduction <add>, %139, %cst_35 [1] : vector<8x8xf32> to vector<8xf32>
    %141 = vector.shape_cast %140 : vector<8xf32> to vector<8x1xf32>
    %142 = tpu.reciprocal %141 {approx = true} : vector<8x1xf32> -> vector<8x1xf32>
    %143 = vector.broadcast %142 : vector<8x1xf32> to vector<8x8xf32>
    %144 = arith.mulf %139, %143 : vector<8x8xf32>
    %145 = arith.truncf %144 : vector<8x8xf32> to vector<8x8xbf16>
    %146 = arith.truncf %113 : vector<8x16xf32> to vector<8x16xbf16>
    %cst_36 = arith.constant dense<0.000000e+00> : vector<8x16xf32>
    %147 = tpu.matmul %145, %146, %cst_36 {dimension_numbers = #tpu.dot_dimension_numbers<[1], [0], [0], [1], [0, 0, 1, 1], [], []>} : vector<8x8xbf16>, vector<8x16xbf16>, vector<8x16xf32> -> vector<8x16xf32>
    %148 = arith.truncf %147 : vector<8x16xf32> to vector<8x16xbf16>
    %c2 = arith.constant 2 : index
    %c0_37 = arith.constant 0 : index
    %c0_38 = arith.constant 0 : index
    %149 = vector.load %arg7[%c2, %c0_37, %c0_38] : memref<4x16x64xbf16, #tpu.memory_space<vmem>>, vector<1x16x64xbf16>
    %150 = vector.shape_cast %149 : vector<1x16x64xbf16> to vector<16x64xbf16>
    %cst_39 = arith.constant dense<0.000000e+00> : vector<8x64xf32>
    %151 = tpu.matmul %148, %150, %cst_39 {dimension_numbers = #tpu.dot_dimension_numbers<[1], [0], [0], [1], [0, 0, 1, 1], [], []>} : vector<8x16xbf16>, vector<16x64xbf16>, vector<8x64xf32> -> vector<8x64xf32>
    %152 = arith.addf %108, %151 : vector<8x64xf32>
    %153 = vector.extract_strided_slice %16 {offsets = [0, 48], sizes = [8, 8], strides = [1, 1]} : vector<8x192xf32> to vector<8x8xf32>
    %154 = vector.extract_strided_slice %16 {offsets = [0, 56], sizes = [8, 8], strides = [1, 1]} : vector<8x192xf32> to vector<8x8xf32>
    %155 = vector.extract_strided_slice %16 {offsets = [0, 112], sizes = [8, 8], strides = [1, 1]} : vector<8x192xf32> to vector<8x8xf32>
    %156 = vector.extract_strided_slice %16 {offsets = [0, 120], sizes = [8, 8], strides = [1, 1]} : vector<8x192xf32> to vector<8x8xf32>
    %157 = vector.extract_strided_slice %16 {offsets = [0, 176], sizes = [8, 16], strides = [1, 1]} : vector<8x192xf32> to vector<8x16xf32>
    %158 = arith.mulf %153, %17 : vector<8x8xf32>
    %159 = arith.mulf %154, %18 : vector<8x8xf32>
    %160 = arith.subf %158, %159 : vector<8x8xf32>
    %161 = arith.mulf %153, %18 : vector<8x8xf32>
    %162 = arith.mulf %154, %17 : vector<8x8xf32>
    %163 = arith.addf %161, %162 : vector<8x8xf32>
    %164 = arith.mulf %155, %17 : vector<8x8xf32>
    %165 = arith.mulf %156, %18 : vector<8x8xf32>
    %166 = arith.subf %164, %165 : vector<8x8xf32>
    %167 = arith.mulf %155, %18 : vector<8x8xf32>
    %168 = arith.mulf %156, %17 : vector<8x8xf32>
    %169 = arith.addf %167, %168 : vector<8x8xf32>
    %170 = arith.truncf %160 : vector<8x8xf32> to vector<8x8xbf16>
    %171 = arith.truncf %166 : vector<8x8xf32> to vector<8x8xbf16>
    "tpu.trace_start"() <{level = 10 : i32, message = "qd,kd->qk"}> : () -> ()
    %cst_40 = arith.constant dense<0.000000e+00> : vector<8x8xf32>
    %172 = tpu.matmul %170, %171, %cst_40 {dimension_numbers = #tpu.dot_dimension_numbers<[1], [1], [0], [0], [0, 0, 1, 0], [], []>} : vector<8x8xbf16>, vector<8x8xbf16>, vector<8x8xf32> -> vector<8x8xf32>
    "tpu.trace_stop"() : () -> ()
    %173 = arith.truncf %163 : vector<8x8xf32> to vector<8x8xbf16>
    %174 = arith.truncf %169 : vector<8x8xf32> to vector<8x8xbf16>
    "tpu.trace_start"() <{level = 10 : i32, message = "qd,kd->qk"}> : () -> ()
    %cst_41 = arith.constant dense<0.000000e+00> : vector<8x8xf32>
    %175 = tpu.matmul %173, %174, %cst_41 {dimension_numbers = #tpu.dot_dimension_numbers<[1], [1], [0], [0], [0, 0, 1, 0], [], []>} : vector<8x8xbf16>, vector<8x8xbf16>, vector<8x8xf32> -> vector<8x8xf32>
    "tpu.trace_stop"() : () -> ()
    %176 = arith.addf %172, %175 : vector<8x8xf32>
    %cst_42 = arith.constant -1.000000e+30 : f32
    %177 = vector.broadcast %cst_42 : f32 to vector<8x8xf32>
    %178 = arith.select %21, %176, %177 : vector<8x8xi1>, vector<8x8xf32>
    %cst_43 = arith.constant dense<0xFF800000> : vector<8xf32>
    %179 = vector.multi_reduction <maximumf>, %178, %cst_43 [1] : vector<8x8xf32> to vector<8xf32>
    %180 = vector.shape_cast %179 : vector<8xf32> to vector<8x1xf32>
    %181 = vector.broadcast %180 : vector<8x1xf32> to vector<8x8xf32>
    %182 = arith.subf %178, %181 : vector<8x8xf32>
    %183 = math.exp %182 : vector<8x8xf32>
    %cst_44 = arith.constant dense<0.000000e+00> : vector<8xf32>
    %184 = vector.multi_reduction <add>, %183, %cst_44 [1] : vector<8x8xf32> to vector<8xf32>
    %185 = vector.shape_cast %184 : vector<8xf32> to vector<8x1xf32>
    %186 = tpu.reciprocal %185 {approx = true} : vector<8x1xf32> -> vector<8x1xf32>
    %187 = vector.broadcast %186 : vector<8x1xf32> to vector<8x8xf32>
    %188 = arith.mulf %183, %187 : vector<8x8xf32>
    %189 = arith.truncf %188 : vector<8x8xf32> to vector<8x8xbf16>
    %190 = arith.truncf %157 : vector<8x16xf32> to vector<8x16xbf16>
    %cst_45 = arith.constant dense<0.000000e+00> : vector<8x16xf32>
    %191 = tpu.matmul %189, %190, %cst_45 {dimension_numbers = #tpu.dot_dimension_numbers<[1], [0], [0], [1], [0, 0, 1, 1], [], []>} : vector<8x8xbf16>, vector<8x16xbf16>, vector<8x16xf32> -> vector<8x16xf32>
    %192 = arith.truncf %191 : vector<8x16xf32> to vector<8x16xbf16>
    %c3 = arith.constant 3 : index
    %c0_46 = arith.constant 0 : index
    %c0_47 = arith.constant 0 : index
    %193 = vector.load %arg7[%c3, %c0_46, %c0_47] : memref<4x16x64xbf16, #tpu.memory_space<vmem>>, vector<1x16x64xbf16>
    %194 = vector.shape_cast %193 : vector<1x16x64xbf16> to vector<16x64xbf16>
    %cst_48 = arith.constant dense<0.000000e+00> : vector<8x64xf32>
    %195 = tpu.matmul %192, %194, %cst_48 {dimension_numbers = #tpu.dot_dimension_numbers<[1], [0], [0], [1], [0, 0, 1, 1], [], []>} : vector<8x16xbf16>, vector<16x64xbf16>, vector<8x64xf32> -> vector<8x64xf32>
    %196 = arith.addf %152, %195 : vector<8x64xf32>
    %197 = arith.addf %0, %196 : vector<8x64xf32>
    %c0_49 = arith.constant 0 : index
    %c0_50 = arith.constant 0 : index
    %198 = vector.load %arg5[%c0_49, %c0_50] : memref<1x64xf32, #tpu.memory_space<vmem>>, vector<1x64xf32>
    %199 = arith.mulf %197, %197 : vector<8x64xf32>
    %cst_51 = arith.constant dense<0.000000e+00> : vector<8xf32>
    %200 = vector.multi_reduction <add>, %199, %cst_51 [1] : vector<8x64xf32> to vector<8xf32>
    %201 = vector.shape_cast %200 : vector<8xf32> to vector<8x1xf32>
    %cst_52 = arith.constant 6.400000e+01 : f32
    %202 = vector.broadcast %cst_52 : f32 to vector<8x1xf32>
    %203 = arith.divf %201, %202 : vector<8x1xf32>
    %cst_53 = arith.constant 9.99999974E-6 : f32
    %204 = vector.broadcast %cst_53 : f32 to vector<8x1xf32>
    %205 = arith.addf %203, %204 : vector<8x1xf32>
    %206 = math.rsqrt %205 : vector<8x1xf32>
    %207 = vector.broadcast %206 : vector<8x1xf32> to vector<8x64xf32>
    %208 = arith.mulf %197, %207 : vector<8x64xf32>
    %209 = vector.broadcast %198 : vector<1x64xf32> to vector<8x64xf32>
    %210 = arith.mulf %208, %209 : vector<8x64xf32>
    %211 = arith.truncf %210 : vector<8x64xf32> to vector<8x64xbf16>
    %c0_54 = arith.constant 0 : index
    %c0_55 = arith.constant 0 : index
    %212 = vector.load %arg8[%c0_54, %c0_55] : memref<64x384xbf16, #tpu.memory_space<vmem>>, vector<64x384xbf16>
    %cst_56 = arith.constant dense<0.000000e+00> : vector<8x384xf32>
    %213 = tpu.matmul %211, %212, %cst_56 {dimension_numbers = #tpu.dot_dimension_numbers<[1], [0], [0], [1], [0, 0, 1, 1], [], []>} : vector<8x64xbf16>, vector<64x384xbf16>, vector<8x384xf32> -> vector<8x384xf32>
    %214 = vector.extract_strided_slice %213 {offsets = [0, 0], sizes = [8, 192], strides = [1, 1]} : vector<8x384xf32> to vector<8x192xf32>
    %215 = vector.extract_strided_slice %213 {offsets = [0, 192], sizes = [8, 192], strides = [1, 1]} : vector<8x384xf32> to vector<8x192xf32>
    %216 = arith.negf %214 : vector<8x192xf32>
    %217 = math.exp %216 : vector<8x192xf32>
    %cst_57 = arith.constant 1.000000e+00 : f32
    %218 = vector.broadcast %cst_57 : f32 to vector<8x192xf32>
    %219 = arith.addf %218, %217 : vector<8x192xf32>
    %220 = arith.divf %218, %219 : vector<8x192xf32>
    %221 = arith.mulf %214, %220 : vector<8x192xf32>
    %222 = arith.mulf %221, %215 : vector<8x192xf32>
    %223 = arith.truncf %222 : vector<8x192xf32> to vector<8x192xbf16>
    %c0_58 = arith.constant 0 : index
    %c0_59 = arith.constant 0 : index
    %224 = vector.load %arg9[%c0_58, %c0_59] : memref<192x64xbf16, #tpu.memory_space<vmem>>, vector<192x64xbf16>
    %cst_60 = arith.constant dense<0.000000e+00> : vector<8x64xf32>
    %225 = tpu.matmul %223, %224, %cst_60 {dimension_numbers = #tpu.dot_dimension_numbers<[1], [0], [0], [1], [0, 0, 1, 1], [], []>} : vector<8x192xbf16>, vector<192x64xbf16>, vector<8x64xf32> -> vector<8x64xf32>
    %226 = arith.addf %197, %225 : vector<8x64xf32>
    %c0_61 = arith.constant 0 : index
    %c0_62 = arith.constant 0 : index
    %227 = vector.load %arg10[%c0_61, %c0_62] : memref<8x64xf32, #tpu.memory_space<vmem>>, vector<8x64xf32>
    tpu.vector_store %arg10[%c0_61, %c0_62], %226 {strides = array<i32>} : memref<8x64xf32, #tpu.memory_space<vmem>>, vector<8x64xf32>,
    return
  }
  func.func @transform_0(%arg0: i32) -> (i32, i32) {
    %c0_i32 = arith.constant 0 : i32
    %c0_i32_0 = arith.constant 0 : i32
    return %arg0, %c0_i32 : i32, i32
  }
  func.func @transform_1(%arg0: i32) -> (i32, i32) {
    %c0_i32 = arith.constant 0 : i32
    %c0_i32_0 = arith.constant 0 : i32
    %c0_i32_1 = arith.constant 0 : i32
    return %c0_i32, %c0_i32_0 : i32, i32
  }
  func.func @transform_2(%arg0: i32) -> (i32, i32) {
    %c0_i32 = arith.constant 0 : i32
    %c0_i32_0 = arith.constant 0 : i32
    %c0_i32_1 = arith.constant 0 : i32
    return %c0_i32, %c0_i32_0 : i32, i32
  }
  func.func @transform_3(%arg0: i32) -> (i32, i32) {
    %c0_i32 = arith.constant 0 : i32
    %c0_i32_0 = arith.constant 0 : i32
    %c0_i32_1 = arith.constant 0 : i32
    return %c0_i32, %c0_i32_0 : i32, i32
  }
  func.func @transform_4(%arg0: i32) -> (i32, i32) {
    %c0_i32 = arith.constant 0 : i32
    %c0_i32_0 = arith.constant 0 : i32
    %c0_i32_1 = arith.constant 0 : i32
    return %c0_i32, %c0_i32_0 : i32, i32
  }
  func.func @transform_5(%arg0: i32) -> (i32, i32) {
    %c0_i32 = arith.constant 0 : i32
    %c0_i32_0 = arith.constant 0 : i32
    %c0_i32_1 = arith.constant 0 : i32
    return %c0_i32, %c0_i32_0 : i32, i32
  }
  func.func @transform_6(%arg0: i32) -> (i32, i32, i32) {
    %c0_i32 = arith.constant 0 : i32
    %c0_i32_0 = arith.constant 0 : i32
    %c0_i32_1 = arith.constant 0 : i32
    %c0_i32_2 = arith.constant 0 : i32
    return %c0_i32, %c0_i32_0, %c0_i32_1 : i32, i32, i32
  }
  func.func @transform_7(%arg0: i32) -> (i32, i32) {
    %c0_i32 = arith.constant 0 : i32
    %c0_i32_0 = arith.constant 0 : i32
    %c0_i32_1 = arith.constant 0 : i32
    return %c0_i32, %c0_i32_0 : i32, i32
  }
  func.func @transform_8(%arg0: i32) -> (i32, i32) {
    %c0_i32 = arith.constant 0 : i32
    %c0_i32_0 = arith.constant 0 : i32
    %c0_i32_1 = arith.constant 0 : i32
    return %c0_i32, %c0_i32_0 : i32, i32
  }
  func.func @transform_9(%arg0: i32) -> (i32, i32) {
    %c0_i32 = arith.constant 0 : i32
    %c0_i32_0 = arith.constant 0 : i32
    return %arg0, %c0_i32 : i32, i32
  }
}

</mosaic_0001>

<bundles_post_ra>
// kernel: llama_forward.5
= control target key start
LH: loop header
LB: loop body
LE: loop exit
PB: predicated region body
PF: predicated region fallthrough
CT: control target
= control target key end

     0   :  { %vm21_vm0 = vcmask 523264   ;;  %s286_s0 = inlined_call_operand.vmem [shape: f32[16,64], index: 0, kind: input, shape index: {}]   ;;  %s287_s1 = inlined_call_operand.vmem [shape: f32[1,64], index: 1, kind: input, shape index: {}]   ;;  %s288_s2 = inlined_call_operand.vmem [shape: bf16[64,256], index: 2, kind: input, shape index: {}]   ;;  %s289_s3 = inlined_call_operand.hbm [shape: f32[16,256], index: 3, kind: output, shape index: {}]  }
   0x1   :  { %v16_v0 = vld [vmem:[%s286_s0] sm:$0xff]  ;;  %v17_v1 = vld [vmem:[%s286_s0 + $0x8] sm:$0xff] }
   0x2   :  { %v19_v2 = vmul.f32 %v16_v0, %v16_v0  ;;  %v20_v3 = vmul.f32 %v17_v1, %v17_v1 }
   0x4   :  { %v22_v4 = vsel %vm21_vm0, %v19_v2, 0.0 }
   0x5   :  { %8 = vsyncpa [#allocation3], 0  ;;  %23 = vadd.xlane.f32.xlu0 %v22_v4  ;;  %v25_v5 = vsel %vm21_vm0, %v20_v3, 0.0  ;;  %v174_v6 = vld [vmem:[%s288_s2 + $0x4] ss:$8 sps:$4 sm:$0xff]   ;;  %v214_v11 = vmov 0  }
   0x6   :  { %v176_v7 = vld [vmem:[%s288_s2] ss:$8 sps:$4 sm:$0xff]   ;;  %v177_v8 = vld [vmem:[%s288_s2 + $0x14] ss:$8 sps:$4 sm:$0xff]   ;;  %97 = vmatprep.subr.bf16.mxu0 %v174_v6  ;;  %v179_v9 = vld [vmem:[%s288_s2 + $0x10] ss:$8 sps:$4 sm:$0xff]   ;;  %129 = vmatprep.mubr.bf16.mxu0 %v214_v11 }
   0x7   :  { %98 = vmatpush1.bf16.msra.mxu0 %v176_v7  ;;  %v180_v10 = vld [vmem:[%s288_s2 + $0x24] ss:$8 sps:$4 sm:$0xff]   ;;  %v182_v12 = vld [vmem:[%s288_s2 + $0x20] ss:$8 sps:$4 sm:$0xff]   ;;  %v183_v13 = vld [vmem:[%s288_s2 + $0x34] ss:$8 sps:$4 sm:$0xff]  }
   0x8   :  { %99 = vmatprep.subr.bf16.mxu0 %v177_v8  ;;  %v185_v14 = vld [vmem:[%s288_s2 + $0x30] ss:$8 sps:$4 sm:$0xff]   ;;  %v160_v24 = vld [vmem:[%s287_s1] ss:$0 sm:$0xff]  ;;  %s215_s2 = smov [#allocation2]  }
   0x9   :  { %26 = vadd.xlane.f32.xlu0 %v25_v5  ;;  %s149_s6 = sshll.u32 %s215_s2, 4  ;;  %s150_s6 = int_to_ptr.vmem [resolvable:$true] %s149_s6 }
   0xa   :  { %s190_s7 = scalar_lea.vmem %s150_s6, 512  ;;  %p195_p1 = scmp.lt.s32.totalorder %s150_s6, %s150_s6 }
   0xb   :  { %100 = vmatpush1.bf16.msra.mxu0 %v179_v9  ;;  %p191_p0 = scmp.ne.s32.totalorder %s150_s6, %s190_s7  ;;  %p196_p2 = scmp.lt.s32.totalorder %s190_s7, %s190_s7 }
   0xc   :  { %101 = vmatprep.subr.bf16.mxu0 %v180_v10 }
   0xd   :  { %p197_p3 = por %p196_p2, %p195_p1 }
   0xf   :  { %102 = vmatpush1.bf16.msra.mxu0 %v182_v12  ;;  %p198_p4 = pnand %p197_p3, %p191_p0 }
  0x10   :  { %103 = vmatprep.subr.bf16.mxu0 %v183_v13 }
  0x13   :  { %104 = vmatpush1.bf16.msra.mxu0 %v185_v14 }
  0x92   :  { %v24_v15 = vpop.xlane.xlu0 %23 }
  0x93   :  { %v29_v16 = vmul.f32 0.015625, %v24_v15 }
  0x95   :  { %v31_v17 = vadd.f32 1e-05, %v29_v16 }
  0x96   :  { %v27_v18 = vpop.xlane.xlu0 %26 }
  0x97   :  { %186 = vrsqrt.f32 %v31_v17  ;;  %v30_v19 = vmul.f32 0.015625, %v27_v18 }
  0x99   :  { %v32_v20 = vadd.f32 1e-05, %v30_v19 }
  0x9b   :  { %188 = vrsqrt.f32 %v32_v20 }
  0xa1   :  { %v187_v21 = vpop.eup %186 }
  0xa2   :  { %v35_v22 = vmul.f32 %v187_v21, %v16_v0 }
  0xa4   :  { %v43_v26 = vmul.f32 %v160_v24, %v35_v22 }
  0xa5   :  { %v189_v23 = vpop.eup %188 }
  0xa6   :  { %v36_v25 = vmul.f32 %v189_v23, %v17_v1 }
  0xa8   :  { %v44_v27 = vmul.f32 %v160_v24, %v36_v25 }
  0xaa   :  { %v45_v28 = vpack.c.bf16 %v44_v27, %v43_v26 }
  0xac   :  { %169 = vmatmul.mubr.msk.bf16.vlgmr.msra.gmra.mrb[0].mxu0 %vm21_vm0, %v45_v28 }
 0x17f   :  { %v131_v29 = vpop.f32.mrb[0].mxu0 }
 0x180   :  { %140 = vst [vmem:[#allocation2] sm:$0xff] %v131_v29  ;;  %v133_v30 = vpop.f32.mrb[1].mxu0 }
 0x181   :  { %141 = vst [vmem:[#allocation2 + $0x8] sm:$0xff] %v133_v30  ;;  %v135_v31 = vpop.f32.mrb[2].mxu0 }
 0x182   :  { %142 = vst [vmem:[#allocation2 + $0x10] sm:$0xff] %v135_v31  ;;  %v137_v32 = vpop.f32.mrb[3].mxu0 }
 0x183   :  { %143 = vst [vmem:[#allocation2 + $0x18] sm:$0xff] %v137_v32 }
 0x184   :  { %201 = shalt.err (!%p198_p4)
}
 0x185   :  { %s202_s9 = scalar_lea.hbm %s289_s3, 512 }
 0x186   :  { %p203_p5 = scmp.ne.s32.totalorder %s289_s3, %s202_s9  ;;  %p206_p6 = scmp.lt.u32.totalorder %s202_s9, %s289_s3 }
 0x188   :  { %p208_p7 = pnand %p206_p6, %p203_p5 }
 0x18a   :  { %211 = shalt.err (!%p208_p7)
}
 0x18b   :  { %s216_s14 = smov 256   ;;  %s217_s15 = smov 16  }
 0x18c   :  { %155 = dma.vmem_to_hbm [thread:$0]  %s150_s6, 512, %s289_s3, [#allocation3], %s216_s14, %s216_s14, %s217_s15  }
 0x18d   :  { %212 = dma.done.wait [#allocation3], 512  }
 0x18e   :  { %213 = vsyncadd [#allocation3], 4294966784 }
 0x18f   :  { %159 = vsyncpa [#allocation3], 1 }

// kernel: llama_forward.3
= control target key start
LH: loop header
LB: loop body
LE: loop exit
PB: predicated region body
PF: predicated region fallthrough
CT: control target
= control target key end

     0   :  { %s2351_s30 = smov 0   ;;  %s2770_s0 = inlined_call_operand.vmem [shape: f32[16,64], index: 0, kind: input, shape index: {}]   ;;  %s2771_s1 = inlined_call_operand.vmem [shape: f32[8,8], index: 1, kind: input, shape index: {}]   ;;  %s2772_s2 = inlined_call_operand.vmem [shape: f32[8,8], index: 2, kind: input, shape index: {}]   ;;  %s2773_s3 = inlined_call_operand.vmem [shape: f32[1,64], index: 3, kind: input, shape index: {}]   ;;  %s2774_s4 = inlined_call_operand.vmem [shape: f32[1,64], index: 4, kind: input, shape index: {}]   ;;  %s2775_s5 = inlined_call_operand.vmem [shape: bf16[64,192], index: 5, kind: input, shape index: {}]   ;;  %s2776_s6 = inlined_call_operand.vmem [shape: bf16[4,16,64], index: 6, kind: input, shape index: {}]   ;;  %s2777_s7 = inlined_call_operand.vmem [shape: bf16[64,384], index: 7, kind: input, shape index: {}]   ;;  %s2778_s8 = inlined_call_operand.vmem [shape: bf16[192,64], index: 8, kind: input, shape index: {}]   ;;  %s2779_s9 = inlined_call_operand.vmem [shape: f32[16,64], index: 9, kind: output, shape index: {}]  }
   0x1 LB: > { %s1941_s10 = sadd.s32 4294967295, %s2281_s30   ;;  %p1945_p0 = scmp.ge.s32.totalorder %s2281_s30, 1  ;;  %s2281_s30 = sphi %s2351_s30, %s19_s30  }
   0x2   : > { %p286_p1 = scmp.lt.s32.totalorder %s2281_s30, 3 }
   0x4   : > { %p287_p2 = pnand %p1945_p0, %p286_p1 }
   0x5   : > { %p320_p3 = scmp.lt.s32.totalorder (!%p287_p2), %s1941_s10, 1  ;;  %vm332_vm0 = vcmask (!%p287_p2), 523264   ;;  %v2203_v3 = vld [vmem:[%s2775_s5 + $0x4] ss:$8 sps:$4 sm:$0xff] (!%p287_p2)   ;;  %v2205_v4 = vld [vmem:[%s2775_s5] ss:$8 sps:$4 sm:$0xff] (!%p287_p2)  }
   0x6   : > { %290 = sbr.rel (%p287_p2) target bundleno = 3905 (0xf41), region = 56  ;;  %v2206_v5 = vld [vmem:[%s2775_s5 + $0x14] ss:$8 sps:$4 sm:$0xff] (!%p287_p2)   ;;  %400 = vmatprep.subr.bf16.mxu1 (!%p287_p2), %v2203_v3  ;;  %v2208_v6 = vld [vmem:[%s2775_s5 + $0x10] ss:$8 sps:$4 sm:$0xff] (!%p287_p2)   ;;  %v2283_v8 = vmov (!%p287_p2), 0  }
   0x7   : > { %401 = vmatpush1.bf16.msra.mxu1 (!%p287_p2), %v2205_v4  ;;  %v2209_v7 = vld [vmem:[%s2775_s5 + $0x24] ss:$8 sps:$4 sm:$0xff] (!%p287_p2)   ;;  %432 = vmatprep.mubr.bf16.mxu1 (!%p287_p2), %v2283_v8  ;;  %v2211_v9 = vld [vmem:[%s2775_s5 + $0x20] ss:$8 sps:$4 sm:$0xff] (!%p287_p2)   ;;  %v2212_v10 = vld [vmem:[%s2775_s5 + $0x34] ss:$8 sps:$4 sm:$0xff] (!%p287_p2)   ;;  %v443_v4 = vlaneseq (!%p287_p2) }
   0x8   : > { %402 = vmatprep.subr.bf16.mxu1 (!%p287_p2), %v2206_v5  ;;  %v2214_v11 = vld [vmem:[%s2775_s5 + $0x30] ss:$8 sps:$4 sm:$0xff] (!%p287_p2)   ;;  %v2400_v12 = vld [vmem:[%s2772_s2] sm:$0xff] (!%p287_p2)  ;;  %s2284_s17 = smov (!%p287_p2), 72   ;;  %s2285_s18 = smov (!%p287_p2), 64   ;;  %v2288_v30 = vmov (!%p287_p2), 0.0  }
   0x9   : > { %v2405_v13 = vld [vmem:[%s2771_s1] sm:$0xff] (!%p287_p2)  ;;  %474 = vrot.lane.b32.xlu1 (!%p287_p2), %v2400_v12, %s2284_s17  ;;  %s2286_s21 = smov (!%p287_p2), 120   ;;  %s2287_s22 = smov (!%p287_p2), 8   ;;  %2083 = vmatprep.subr.bf16.mxu0 (!%p287_p2), %v2288_v30  ;;  %vm2289_vm1 = vmmov (!%p287_p2), 0   ;;  %vm503_vm2 = vcmask (!%p287_p2), 64512   ;;  %vm616_vm3 = vcmask (!%p287_p2), 1043456  }
   0xa   : > { %v1948_v18 = vld [vmem:[%s2773_s3] ss:$0 sm:$0xff] (!%p287_p2)  ;;  %2085 = vmatprep.mubr.msk.bf16.mxu0 (!%p287_p2), %vm2289_vm1, %v2288_v30  ;;  %s2290_s23 = smov (!%p287_p2), 88   ;;  %s2291_s24 = smov (!%p287_p2), 24   ;;  %v2477_v5 = vshrl.u32 (!%p287_p2), %v443_v4, 7  ;;  %vm895_vm5 = vcmask (!%p287_p2), 130048  }
   0xb   : > { %403 = vmatpush1.bf16.msra.mxu1 (!%p287_p2), %v2208_v6  ;;  %s2292_s25 = smov (!%p287_p2), 80   ;;  %s2293_s26 = smov (!%p287_p2), 16   ;;  %v2479_v6 = vand.u32 (!%p287_p2), 127, %v443_v4 }
   0xc   : > { %404 = vmatprep.subr.bf16.mxu1 (!%p287_p2), %v2209_v7  ;;  %s2294_s27 = smov (!%p287_p2), 48   ;;  %s2295_s28 = smov (!%p287_p2), 112  }
   0xd   : > { %s2781_s10 = smov (!%p320_p3, %s1941_s10), 1  ;;  %483 = vrot.lane.b32.xlu1 %v2400_v12, %s2285_s18  ;;  %vm447_vm4 = vcmp.ge.s32.totalorder %v2477_v5, %v2479_v6  ;;  %s2296_s13 = smov 104   ;;  %v2217_v6 = vld [vmem:[%s2776_s6 + $0x10] sm:$0xff]  }
   0xe   : > { %s1946_s11 = sshll.u32 %s2781_s10, 3  ;;  %s2298_s15 = smov 96  }
   0xf   : > { %s323_s14 = scalar_lea.vmem %s2770_s0, %s1946_s11  ;;  %405 = vmatpush1.bf16.msra.mxu1 %v2211_v9  ;;  %s2299_s16 = smov 32  }
  0x10   : > { %v2367_v0 = vld [vmem:[%s323_s14] sm:$0xff]  ;;  %406 = vmatprep.subr.bf16.mxu1 %v2212_v10  ;;  %s2297_s14 = smov 40   ;;  %s2300_s20 = smov 56  }
  0x11   : > { %v331_v1 = vmul.f32 %v2367_v0, %v2367_v0 }
  0x13   : > { %v333_v2 = vsel %vm332_vm0, %v331_v1, 0.0  ;;  %407 = vmatpush1.bf16.msra.mxu1 %v2214_v11 }
  0x14   : > { %334 = vadd.xlane.f32.xlu0 %v333_v2  ;;  %2053 = vmatprep.subr.bf16.mxu1 %v2288_v30 }
  0x2a   : > { %487 = vrot.lane.b32.xlu0 %v2405_v13, %s2284_s17 }
  0x7b   : > { %v475_v28 = vpop.permute.xlu1 %474 }
  0x7f   : > { %v484_v31 = vpop.permute.xlu1 %483 }
  0xa1   : > { %v335_v14 = vpop.xlane.xlu0 %334 }
  0xa2   : > { %v337_v15 = vmul.f32 0.015625, %v335_v14 }
  0xa4   : > { %v338_v16 = vadd.f32 1e-05, %v337_v15 }
  0xa5   : > { %v488_v22 = vpop.permute.xlu0 %487 }
  0xa6   : > { %2247 = vrsqrt.f32 %v338_v16 }
  0xb0   : > { %v2248_v17 = vpop.eup %2247 }
  0xb1   : > { %v340_v19 = vmul.f32 %v2248_v17, %v2367_v0 }
  0xb3   : > { %v347_v20 = vmul.f32 %v1948_v18, %v340_v19 }
  0xb5   : > { %v348_v21 = vpack.c.bf16 %v347_v20, %v347_v20 }
  0xb7   : > { %1957 = vmatmul.mubr.msk.bf16.vlgmr.msra.gmra.mrb[0].mxu1 %vm332_vm0, %v348_v21 }
  0xb8   : > { %2055 = vmatprep.mubr.msk.bf16.mxu1 %vm2289_vm1, %v2288_v30 }
 0x18a   : > { %v2416_v23 = vpop.f32.mrb[0].mxu1 }
 0x18b   : > { %v490_v24 = vmul.f32 %v488_v22, %v2416_v23  ;;  %v436_v25 = vpop.f32.mrb[1].mxu1  ;;  %v477_v29 = vmul.f32 %v475_v28, %v2416_v23  ;;  %v486_v32 = vmul.f32 %v484_v31, %v2416_v23  ;;  %v459_v47 = vmul.f32 %v2400_v12, %v2416_v23 }
 0x18c   : > { %v438_v26 = vpop.f32.mrb[2].mxu1  ;;  %v448_v53 = vmul.f32 %v2405_v13, %v2416_v23  ;;  %v2457_v57 = vpack.c.bf16 %v436_v25, %v436_v25 }
 0x18d   : > { %v439_v27 = vpop.f32.mrb[3].mxu1  ;;  %492 = vrot.lane.b32.xlu1 %v490_v24, %s2286_s21 }
 0x18e   : > { %v618_v60 = vsel %vm616_vm3, %v2457_v57, 0 }
 0x191   : > { %461 = vrot.lane.b32.xlu1 %v2405_v13, %s2287_s22 }
 0x195   : > { %470 = vrot.lane.b32.xlu1 %v2405_v13, %s2285_s18 }
 0x199   : > { %479 = vrot.lane.b32.xlu1 %v477_v29, %s2286_s21 }
 0x19d   : > { %450 = vrot.lane.b32.xlu1 %v2400_v12, %s2287_s22 }
 0x1ff   : > { %v493_v33 = vpop.permute.xlu1 %492 }
 0x200   : > { %v495_v34 = vadd.f32 %v493_v33, %v486_v32 }
 0x202   : > { %v499_v35 = vpack.c.bf16 %v495_v34, %v495_v34 }
 0x203   : > { %v462_v36 = vpop.permute.xlu1 %461 }
 0x204   : > { %v464_v37 = vmul.f32 %v462_v36, %v2416_v23  ;;  %501 = vrot.lane.b32.xlu0 %v499_v35, %s2285_s18 }
 0x206   : > { %466 = vrot.lane.b32.xlu1 %v464_v37, %s2286_s21 }
 0x207   : > { %v471_v38 = vpop.permute.xlu1 %470 }
 0x208   : > { %v473_v39 = vmul.f32 %v471_v38, %v2416_v23 }
 0x20b   : > { %v480_v40 = vpop.permute.xlu1 %479 }
 0x20c   : > { %v482_v41 = vsub.f32 %v473_v39, %v480_v40 }
 0x20e   : > { %v497_v42 = vpack.c.bf16 %v482_v41, %v482_v41 }
 0x20f   : > { %v451_v43 = vpop.permute.xlu1 %450 }
 0x210   : > { %v453_v44 = vmul.f32 %v451_v43, %v2416_v23  ;;  %551 = vrot.lane.b32.xlu0 %v497_v42, %s2285_s18 }
 0x212   : > { %455 = vrot.lane.b32.xlu1 %v453_v44, %s2286_s21 }
 0x214   : > { %706 = vrot.lane.b32.xlu0 %v2405_v13, %s2290_s23 }
 0x218   : > { %680 = vrot.lane.b32.xlu0 %v2405_v13, %s2291_s24 }
 0x21c   : > { %693 = vrot.lane.b32.xlu0 %v2400_v12, %s2290_s23 }
 0x220   : > { %667 = vrot.lane.b32.xlu0 %v2400_v12, %s2291_s24 }
 0x224   : > { %702 = vrot.lane.b32.xlu0 %v2400_v12, %s2292_s25 }
 0x276   : > { %v502_v45 = vpop.permute.xlu0 %501 }
 0x277   : > { %v508_v46 = vsel %vm503_vm2, %v502_v45, 0 }
 0x278   : > { %2054 = vmatpush3.bf16.xpose.msra.mxu1 %v508_v46  ;;  %v467_v48 = vpop.permute.xlu1 %466 }
 0x279   : > { %v469_v49 = vadd.f32 %v467_v48, %v459_v47  ;;  %2059 = vmatprep.subr.bf16.mxu1 %v2288_v30 }
 0x27b   : > { %v498_v50 = vpack.c.bf16 %v469_v49, %v469_v49 }
 0x27f   : > { %2056 = vmatmul.mubr.msk.bf16.vlgmr.msra.gmra.mrb[4].mxu1 %vm503_vm2, %v498_v50 }
 0x280   : > { %2061 = vmatprep.mubr.msk.bf16.mxu1 %vm2289_vm1, %v2288_v30 }
 0x282   : > { %v552_v51 = vpop.permute.xlu0 %551 }
 0x283   : > { %v557_v52 = vsel %vm503_vm2, %v552_v51, 0 }
 0x284   : > { %2060 = vmatpush3.bf16.xpose.msra.mxu1 %v557_v52  ;;  %v456_v54 = vpop.permute.xlu1 %455 }
 0x285   : > { %v458_v55 = vsub.f32 %v448_v53, %v456_v54  ;;  %2065 = vmatprep.subr.bf16.mxu1 %v2288_v30  ;;  %v2215_v53 = vld [vmem:[%s2776_s6] sm:$0xff]  }
 0x286   : > { %v707_v56 = vpop.permute.xlu0 %706 }
 0x287   : > { %v709_v58 = vmul.f32 %v707_v56, %v2416_v23  ;;  %v496_v59 = vpack.c.bf16 %v458_v55, %v458_v55 }
 0x289   : > { %711 = vrot.lane.b32.xlu0 %v709_v58, %s2286_s21 }
 0x28a   : > { %v681_v61 = vpop.permute.xlu0 %680 }
 0x28b   : > { %2062 = vmatmul.mubr.msk.bf16.vlgmr.msra.gmra.mrb[4].mxu1 %vm503_vm2, %v496_v59  ;;  %v683_v62 = vmul.f32 %v681_v61, %v2416_v23 }
 0x28c   : > { %2066 = vmatpush3.bf16.msra.mxu1 %v618_v60  ;;  %2067 = vmatprep.mubr.msk.bf16.mxu1 %vm2289_vm1, %v2288_v30 }
 0x28d   : > { %676 = vrot.lane.b32.xlu0 %v2400_v12, %s2293_s26  ;;  %2071 = vmatprep.subr.bf16.mxu1 %v2288_v30 }
 0x28e   : > { %v694_v63 = vpop.permute.xlu0 %693 }
 0x28f   : > { %v696_v1 = vmul.f32 %v694_v63, %v2416_v23 }
 0x291   : > { %685 = vrot.lane.b32.xlu0 %v683_v62, %s2286_s21 }
 0x292   : > { %v668_v2 = vpop.permute.xlu0 %667 }
 0x293   : > { %v670_v3 = vmul.f32 %v668_v2, %v2416_v23 }
 0x295   : > { %689 = vrot.lane.b32.xlu0 %v2405_v13, %s2292_s25 }
 0x296   : > { %v703_v7 = vpop.permute.xlu0 %702 }
 0x297   : > { %v705_v20 = vmul.f32 %v703_v7, %v2416_v23 }
 0x299   : > { %698 = vrot.lane.b32.xlu0 %v696_v1, %s2286_s21 }
 0x29d   : > { %672 = vrot.lane.b32.xlu0 %v670_v3, %s2286_s21 }
 0x2fb   : > { %v712_v9 = vpop.permute.xlu0 %711 }
 0x2fc   : > { %v714_v22 = vadd.f32 %v712_v9, %v705_v20 }
 0x2fe   : > { %v718_v25 = vpack.c.bf16 %v714_v22, %v714_v22 }
 0x2ff   : > { %v677_v18 = vpop.permute.xlu0 %676 }
 0x300   : > { %v679_v24 = vmul.f32 %v677_v18, %v2416_v23 }
 0x303   : > { %v686_v19 = vpop.permute.xlu0 %685 }
 0x304   : > { %v688_v26 = vadd.f32 %v686_v19, %v679_v24 }
 0x306   : > { %v717_v29 = vpack.c.bf16 %v688_v26, %v688_v26 }
 0x307   : > { %v690_v21 = vpop.permute.xlu0 %689 }
 0x308   : > { %v692_v28 = vmul.f32 %v690_v21, %v2416_v23 }
 0x30b   : > { %v699_v27 = vpop.permute.xlu0 %698 }
 0x30c   : > { %v701_v31 = vsub.f32 %v692_v28, %v699_v27 }
 0x30e   : > { %v716_v32 = vpack.c.bf16 %v701_v31, %v701_v31 }
 0x30f   : > { %v673_v38 = vpop.permute.xlu0 %672 }
 0x35e   : > { %v593_v10 = vpop.f32.mrb[4].mxu1 }
 0x35f   : > { %v599_v11 = vsel %vm447_vm4, %v593_v10, -1e+30  ;;  %v2063_v14 = vpop.f32.mrb[5].mxu1 }
 0x360   : > { %v596_v15 = vpop.f32.mrb[6].mxu1  ;;  %v600_v16 = vsel %vm503_vm2, %v599_v11, -inf }
 0x361   : > { %601 = vmax.xlane.f32.xlu1 %v600_v16  ;;  %v2064_v17 = vpop.f32.mrb[7].mxu1 }
 0x372   : > { %663 = vrot.lane.b32.xlu1 %v2405_v13, %s2293_s26 }
 0x376   : > { %723 = vrot.lane.b32.xlu1 %v718_v25, %s2294_s27 }
 0x37a   : > { %720 = vrot.lane.b32.xlu1 %v717_v29, %s2295_s28 }
 0x37e   : > { %775 = vrot.lane.b32.xlu1 %v716_v32, %s2294_s27 }
 0x3ee   : > { %v602_v33 = vpop.xlane.xlu1 %601 }
 0x3ef   : > { %v603_v34 = vsub.f32 %v599_v11, %v602_v33  ;;  %v2216_v33 = vld [vmem:[%s2776_s6 + $0x8] sm:$0xff]  }
 0x3f1   : > { %v604_v35 = vmul.f32 1.442695, %v603_v34 }
 0x3f2   : > { %v664_v36 = vpop.permute.xlu1 %663 }
 0x3f3   : > { %2249 = vpow2.f32 %v604_v35  ;;  %v666_v37 = vmul.f32 %v664_v36, %v2416_v23 }
 0x3f5   : > { %v675_v39 = vsub.f32 %v666_v37, %v673_v38 }
 0x3f6   : > { %v724_v44 = vpop.permute.xlu1 %723 }
 0x3f7   : > { %v715_v40 = vpack.c.bf16 %v675_v39, %v675_v39  ;;  %v729_v49 = vsel %vm503_vm2, %v724_v44, 0 }
 0x3f9   : > { %772 = vrot.lane.b32.xlu1 %v715_v40, %s2295_s28 }
 0x3fa   : > { %v721_v48 = vpop.permute.xlu1 %720 }
 0x3fd   : > { %v2250_v41 = vpop.eup %2249 }
 0x3fe   : > { %v606_v42 = vsel %vm503_vm2, %v2250_v41, 0.0  ;;  %v776_v50 = vpop.permute.xlu1 %775 }
 0x3ff   : > { %607 = vadd.xlane.f32.xlu0 %v606_v42  ;;  %v781_v51 = vsel %vm503_vm2, %v776_v50, 0 }
 0x46b   : > { %v773_v52 = vpop.permute.xlu1 %772 }
 0x48c   : > { %v608_v43 = vpop.xlane.xlu0 %607 }
 0x48d   : > { %2251 = vrcp.f32 %v608_v43 }
 0x497   : > { %v2252_v45 = vpop.eup %2251 }
 0x498   : > { %v610_v46 = vmul.f32 %v2252_v45, %v2250_v41 }
 0x49a   : > { %v611_v47 = vpack.c.bf16 %v610_v46, %v610_v46 }
 0x49c   : > { %2068 = vmatmul.mubr.msk.bf16.vlgmr.msra.gmra.mrb[8].mxu1 %vm503_vm2, %v611_v47 }
 0x49d   : > { %2072 = vmatpush3.bf16.xpose.msra.mxu1 %v729_v49  ;;  %2073 = vmatprep.mubr.msk.bf16.mxu1 %vm2289_vm1, %v2288_v30 }
 0x49e   : > { %2077 = vmatprep.subr.bf16.mxu1 %v2288_v30 }
 0x4a4   : > { %2074 = vmatmul.mubr.msk.bf16.vlgmr.msra.gmra.mrb[12].mxu1 %vm503_vm2, %v721_v48 }
 0x4a5   : > { %2078 = vmatpush3.bf16.xpose.msra.mxu1 %v781_v51  ;;  %2079 = vmatprep.mubr.msk.bf16.mxu1 %vm2289_vm1, %v2288_v30 }
 0x4a6   : > { %2095 = vmatprep.subr.bf16.mxu1 %v2288_v30 }
 0x4b0   : > { %2080 = vmatmul.mubr.msk.bf16.vlgmr.msra.gmra.mrb[12].mxu1 %vm503_vm2, %v773_v52 }
 0x4b1   : > { %2097 = vmatprep.mubr.msk.bf16.mxu1 %vm2289_vm1, %v2288_v30  ;;  %2096 = vmatpush3.bf16.msra.mxu1 %v2215_v53 }
 0x4b2   : > { %2113 = vmatprep.subr.bf16.mxu1 %v2288_v30 }
 0x56f   : > { %v654_v54 = vpop.f32.mrb[8].mxu1 }
 0x570   : > { %v660_v55 = vpack.c.bf16 %v654_v54, %v654_v54  ;;  %v2069_v56 = vpop.f32.mrb[9].mxu1 }
 0x571   : > { %v657_v58 = vpop.f32.mrb[10].mxu1 }
 0x572   : > { %v2070_v59 = vpop.f32.mrb[11].mxu1  ;;  %2098 = vmatmul.mubr.msk.bf16.vlgmr.msra.gmra.mrb[16].mxu1 %vm895_vm5, %v660_v55 }
 0x573   : > { %2115 = vmatprep.mubr.msk.bf16.mxu1 %vm2289_vm1, %v2288_v30 }
 0x583   : > { %v817_v60 = vpop.f32.mrb[12].mxu1 }
 0x584   : > { %v823_v61 = vsel %vm447_vm4, %v817_v60, -1e+30  ;;  %v2081_v62 = vpop.f32.mrb[13].mxu1 }
 0x585   : > { %v820_v63 = vpop.f32.mrb[14].mxu1  ;;  %v824_v1 = vsel %vm503_vm2, %v823_v61, -inf }
 0x586   : > { %825 = vmax.xlane.f32.xlu1 %v824_v1  ;;  %v2082_v2 = vpop.f32.mrb[15].mxu1 }
 0x597   : > { %1018 = vrot.lane.b32.xlu1 %v2400_v12, %s2296_s13 }
 0x613   : > { %v826_v3 = vpop.xlane.xlu1 %825 }
 0x614   : > { %v827_v4 = vsub.f32 %v823_v61, %v826_v3 }
 0x616   : > { %v828_v7 = vmul.f32 1.442695, %v827_v4 }
 0x617   : > { %v1019_v27 = vpop.permute.xlu1 %1018 }
 0x618   : > { %2253 = vpow2.f32 %v828_v7  ;;  %v1021_v29 = vmul.f32 %v1019_v27, %v2416_v23 }
 0x622   : > { %v2254_v9 = vpop.eup %2253 }
 0x623   : > { %v830_v10 = vsel %vm503_vm2, %v2254_v9, 0.0 }
 0x624   : > { %831 = vadd.xlane.f32.xlu0 %v830_v10 }
 0x63a   : > { %837 = vrot.lane.b32.xlu0 %v2457_v57, %s2295_s28 }
 0x63e   : > { %1031 = vrot.lane.b32.xlu0 %v2405_v13, %s2296_s13 }
 0x642   : > { %1005 = vrot.lane.b32.xlu0 %v2405_v13, %s2297_s14 }
 0x645   : > { %v2528_v11 = vpop.f32.mrb[16].mxu1 }
 0x646   : > { %v2099_v14 = vpop.f32.mrb[17].mxu1  ;;  %992 = vrot.lane.b32.xlu0 %v2400_v12, %s2297_s14 }
 0x647   : > { %v985_v15 = vpop.f32.mrb[18].mxu1 }
 0x648   : > { %v2100_v16 = vpop.f32.mrb[19].mxu1 }
 0x64a   : > { %1027 = vrot.lane.b32.xlu0 %v2400_v12, %s2298_s15 }
 0x6b1   : > { %v832_v17 = vpop.xlane.xlu0 %831 }
 0x6b2   : > { %2255 = vrcp.f32 %v832_v17 }
 0x6b5   : > { %v838_v18 = vpop.permute.xlu0 %837 }
 0x6b6   : > { %v843_v19 = vsel %vm616_vm3, %v838_v18, 0 }
 0x6b7   : > { %2084 = vmatpush3.bf16.msra.mxu0 %v843_v19 }
 0x6b8   : > { %2089 = vmatprep.subr.bf16.mxu0 %v2288_v30 }
 0x6b9   : > { %v1032_v20 = vpop.permute.xlu0 %1031 }
 0x6ba   : > { %v1034_v21 = vmul.f32 %v1032_v20, %v2416_v23 }
 0x6bc   : > { %v2256_v22 = vpop.eup %2255  ;;  %1036 = vrot.lane.b32.xlu0 %v1034_v21, %s2286_s21 }
 0x6bd   : > { %v1006_v24 = vpop.permute.xlu0 %1005  ;;  %v834_v25 = vmul.f32 %v2256_v22, %v2254_v9 }
 0x6be   : > { %v1008_v26 = vmul.f32 %v1006_v24, %v2416_v23 }
 0x6bf   : > { %v835_v28 = vpack.c.bf16 %v834_v25, %v834_v25 }
 0x6c0   : > { %1001 = vrot.lane.b32.xlu0 %v2400_v12, %s2299_s16  ;;  %1010 = vrot.lane.b32.xlu1 %v1008_v26, %s2286_s21 }
 0x6c1   : > { %2086 = vmatmul.mubr.msk.bf16.vlgmr.msra.gmra.mrb[0].mxu0 %vm503_vm2, %v835_v28  ;;  %v993_v31 = vpop.permute.xlu0 %992 }
 0x6c2   : > { %2091 = vmatprep.mubr.msk.bf16.mxu0 %vm2289_vm1, %v2288_v30  ;;  %v995_v32 = vmul.f32 %v993_v31, %v2416_v23  ;;  %2090 = vmatpush3.bf16.msra.mxu0 %v2216_v33 }
 0x6c3   : > { %2101 = vmatprep.subr.bf16.mxu0 %v2288_v30 }
 0x6c4   : > { %1014 = vrot.lane.b32.xlu0 %v2405_v13, %s2298_s15  ;;  %1023 = vrot.lane.b32.xlu1 %v1021_v29, %s2286_s21 }
 0x6c5   : > { %v1028_v34 = vpop.permute.xlu0 %1027 }
 0x6c6   : > { %v1030_v35 = vmul.f32 %v1028_v34, %v2416_v23 }
 0x6c8   : > { %988 = vrot.lane.b32.xlu0 %v2405_v13, %s2299_s16  ;;  %997 = vrot.lane.b32.xlu1 %v995_v32, %s2286_s21 }
 0x72e   : > { %v1037_v36 = vpop.permute.xlu0 %1036 }
 0x72f   : > { %v1039_v37 = vadd.f32 %v1037_v36, %v1030_v35 }
 0x731   : > { %v1043_v38 = vpack.c.bf16 %v1039_v37, %v1039_v37 }
 0x732   : > { %v1002_v39 = vpop.permute.xlu0 %1001  ;;  %v1011_v40 = vpop.permute.xlu1 %1010 }
 0x733   : > { %v1004_v41 = vmul.f32 %v1002_v39, %v2416_v23  ;;  %1048 = vrot.lane.b32.xlu0 %v1043_v38, %s2299_s16 }
 0x735   : > { %v1013_v42 = vadd.f32 %v1011_v40, %v1004_v41 }
 0x736   : > { %v1015_v43 = vpop.permute.xlu0 %1014  ;;  %v1024_v44 = vpop.permute.xlu1 %1023 }
 0x737   : > { %v1042_v45 = vpack.c.bf16 %v1013_v42, %v1013_v42  ;;  %v1017_v46 = vmul.f32 %v1015_v43, %v2416_v23 }
 0x739   : > { %v1026_v47 = vsub.f32 %v1017_v46, %v1024_v44  ;;  %1045 = vrot.lane.b32.xlu1 %v1042_v45, %s2298_s15 }
 0x73a   : > { %v989_v48 = vpop.permute.xlu0 %988  ;;  %v998_v51 = vpop.permute.xlu1 %997 }
 0x73b   : > { %v1041_v49 = vpack.c.bf16 %v1026_v47, %v1026_v47  ;;  %v991_v50 = vmul.f32 %v989_v48, %v2416_v23 }
 0x73d   : > { %v1000_v52 = vsub.f32 %v991_v50, %v998_v51  ;;  %1100 = vrot.lane.b32.xlu0 %v1041_v49, %s2299_s16 }
 0x73f   : > { %v1040_v53 = vpack.c.bf16 %v1000_v52, %v1000_v52 }
 0x741   : > { %1306 = vrot.lane.b32.xlu0 %v2405_v13, %s2286_s21  ;;  %1097 = vrot.lane.b32.xlu1 %v1040_v53, %s2298_s15 }
 0x745   : > { %1293 = vrot.lane.b32.xlu0 %v2400_v12, %s2286_s21  ;;  %1280 = vrot.lane.b32.xlu1 %v2405_v13, %s2300_s20 }
 0x749   : > { %1302 = vrot.lane.b32.xlu0 %v2400_v12, %s2295_s28  ;;  %1267 = vrot.lane.b32.xlu1 %v2400_v12, %s2300_s20 }
 0x74d   : > { %1276 = vrot.lane.b32.xlu0 %v2400_v12, %s2294_s27 }
 0x751   : > { %1289 = vrot.lane.b32.xlu0 %v2405_v13, %s2295_s28 }
 0x755   : > { %1263 = vrot.lane.b32.xlu0 %v2405_v13, %s2294_s27 }
 0x794   : > { %v879_v54 = vpop.f32.mrb[0].mxu0 }
 0x795   : > { %v885_v55 = vpack.c.bf16 %v879_v54, %v879_v54  ;;  %v2087_v56 = vpop.f32.mrb[1].mxu0 }
 0x796   : > { %v882_v58 = vpop.f32.mrb[2].mxu0 }
 0x797   : > { %v2088_v59 = vpop.f32.mrb[3].mxu0  ;;  %2092 = vmatmul.mubr.msk.bf16.vlgmr.msra.gmra.mrb[4].mxu0 %vm895_vm5, %v885_v55 }
 0x798   : > { %2103 = vmatprep.mubr.msk.bf16.mxu0 %vm2289_vm1, %v2288_v30 }
 0x7a5   : > { %v1049_v60 = vpop.permute.xlu0 %1048 }
 0x7a6   : > { %v1054_v61 = vsel %vm503_vm2, %v1049_v60, 0 }
 0x7a7   : > { %2102 = vmatpush3.bf16.xpose.msra.mxu0 %v1054_v61 }
 0x7a8   : > { %2107 = vmatprep.subr.bf16.mxu0 %v2288_v30 }
 0x7ab   : > { %v1046_v12 = vpop.permute.xlu1 %1045 }
 0x7ae   : > { %2104 = vmatmul.mubr.msk.bf16.vlgmr.msra.gmra.mrb[8].mxu0 %vm503_vm2, %v1046_v12 }
 0x7af   : > { %v1101_v13 = vpop.permute.xlu0 %1100  ;;  %2109 = vmatprep.mubr.msk.bf16.mxu0 %vm2289_vm1, %v2288_v30 }
 0x7b0   : > { %v1106_v62 = vsel %vm503_vm2, %v1101_v13, 0 }
 0x7b1   : > { %2108 = vmatpush3.bf16.xpose.msra.mxu0 %v1106_v62 }
 0x7b2   : > { %2125 = vmatprep.subr.bf16.mxu0 %v2288_v30 }
 0x7b3   : > { %v1307_v63 = vpop.permute.xlu0 %1306  ;;  %v1098_v1 = vpop.permute.xlu1 %1097 }
 0x7b4   : > { %v1309_v2 = vmul.f32 %v1307_v63, %v2416_v23 }
 0x7b6   : > { %1311 = vrot.lane.b32.xlu1 %v1309_v2, %s2286_s21 }
 0x7b7   : > { %v1281_v3 = vpop.permute.xlu1 %1280  ;;  %v1294_v7 = vpop.permute.xlu0 %1293 }
 0x7b8   : > { %v1283_v4 = vmul.f32 %v1281_v3, %v2416_v23  ;;  %v1296_v9 = vmul.f32 %v1294_v7, %v2416_v23 }
 0x7ba   : > { %2110 = vmatmul.mubr.msk.bf16.vlgmr.msra.gmra.mrb[8].mxu0 %vm503_vm2, %v1098_v1  ;;  %1285 = vrot.lane.b32.xlu1 %v1283_v4, %s2286_s21 }
 0x7bb   : > { %2127 = vmatprep.mubr.msk.bf16.mxu0 %vm2289_vm1, %v2288_v30  ;;  %v1268_v10 = vpop.permute.xlu1 %1267  ;;  %v1303_v15 = vpop.permute.xlu0 %1302 }
 0x7bc   : > { %v1270_v14 = vmul.f32 %v1268_v10, %v2416_v23  ;;  %v1305_v17 = vmul.f32 %v1303_v15, %v2416_v23 }
 0x7be   : > { %1298 = vrot.lane.b32.xlu1 %v1296_v9, %s2286_s21 }
 0x7bf   : > { %v1277_v16 = vpop.permute.xlu0 %1276 }
 0x7c0   : > { %v1279_v21 = vmul.f32 %v1277_v16, %v2416_v23 }
 0x7c2   : > { %1272 = vrot.lane.b32.xlu1 %v1270_v14, %s2286_s21 }
 0x7c3   : > { %v1290_v20 = vpop.permute.xlu0 %1289 }
 0x7c4   : > { %v1292_v26 = vmul.f32 %v1290_v20, %v2416_v23 }
 0x7c7   : > { %v1264_v28 = vpop.permute.xlu0 %1263 }
 0x7c8   : > { %v1266_v32 = vmul.f32 %v1264_v28, %v2416_v23 }
 0x828   : > { %v1312_v18 = vpop.permute.xlu1 %1311 }
 0x829   : > { %v1314_v19 = vadd.f32 %v1312_v18, %v1305_v17 }
 0x82b   : > { %v1318_v22 = vpack.c.bf16 %v1314_v19, %v1314_v19 }
 0x82c   : > { %v1286_v24 = vpop.permute.xlu1 %1285 }
 0x82d   : > { %v1288_v25 = vadd.f32 %v1286_v24, %v1279_v21  ;;  %1323 = vrot.lane.b32.xlu0 %v1318_v22, %s2293_s26 }
 0x82f   : > { %v1317_v27 = vpack.c.bf16 %v1288_v25, %v1288_v25 }
 0x830   : > { %v1299_v29 = vpop.permute.xlu1 %1298 }
 0x831   : > { %v1301_v31 = vsub.f32 %v1292_v26, %v1299_v29  ;;  %1320 = vrot.lane.b32.xlu1 %v1317_v27, %s2292_s25  ;;  %v2218_v26 = vld [vmem:[%s2776_s6 + $0x18] sm:$0xff]  }
 0x833   : > { %v1316_v33 = vpack.c.bf16 %v1301_v31, %v1301_v31 }
 0x834   : > { %v1273_v34 = vpop.permute.xlu1 %1272 }
 0x835   : > { %v1275_v35 = vsub.f32 %v1266_v32, %v1273_v34  ;;  %1375 = vrot.lane.b32.xlu0 %v1316_v33, %s2293_s26 }
 0x837   : > { %v1315_v36 = vpack.c.bf16 %v1275_v35, %v1275_v35 }
 0x839   : > { %1372 = vrot.lane.b32.xlu1 %v1315_v36, %s2292_s25 }
 0x86a   : > { %v933_v37 = vpop.f32.mrb[4].mxu0 }
 0x86b   : > { %v2608_v38 = vadd.f32 %v2528_v11, %v933_v37  ;;  %v2093_v39 = vpop.f32.mrb[5].mxu0 }
 0x86c   : > { %v936_v40 = vpop.f32.mrb[6].mxu0 }
 0x86d   : > { %v2094_v41 = vpop.f32.mrb[7].mxu0 }
 0x88d   : > { %v1142_v42 = vpop.f32.mrb[8].mxu0 }
 0x88e   : > { %v1148_v23 = vsel %vm447_vm4, %v1142_v42, -1e+30  ;;  %v2111_v43 = vpop.f32.mrb[9].mxu0 }
 0x88f   : > { %v1145_v44 = vpop.f32.mrb[10].mxu0  ;;  %v1149_v45 = vsel %vm503_vm2, %v1148_v23, -inf }
 0x890   : > { %v2112_v46 = vpop.f32.mrb[11].mxu0  ;;  %1150 = vmax.xlane.f32.xlu0 %v1149_v45  ;;  %v2221_v45 = vld [vmem:[%s2777_s7 + $0x4] ss:$12 sps:$4 sm:$0xff]  }
 0x891   : > { %v2219_v46 = vld [vmem:[%s2777_s7] ss:$12 sps:$4 sm:$0xff]  }
 0x89f   : > { %v1324_v47 = vpop.permute.xlu0 %1323 }
 0x8a0   : > { %v1329_v48 = vsel %vm503_vm2, %v1324_v47, 0  ;;  %v2225_v47 = vld [vmem:[%s2777_s7 + $0x1c] ss:$12 sps:$4 sm:$0xff]  }
 0x8a1   : > { %2126 = vmatpush3.bf16.xpose.msra.mxu0 %v1329_v48  ;;  %v2223_v48 = vld [vmem:[%s2777_s7 + $0x18] ss:$12 sps:$4 sm:$0xff]  }
 0x8a2   : > { %2131 = vmatprep.subr.bf16.mxu0 %v2288_v30 }
 0x8a3   : > { %v1321_v11 = vpop.permute.xlu1 %1320 }
 0x8a6   : > { %1161 = vrot.lane.b32.xlu0 %v2457_v57, %s2298_s15 }
 0x8a7   : > { %v1376_v49 = vpop.permute.xlu0 %1375 }
 0x8a8   : > { %v1381_v50 = vsel %vm503_vm2, %v1376_v49, 0  ;;  %2128 = vmatmul.mubr.msk.bf16.vlgmr.msra.gmra.mrb[12].mxu0 %vm503_vm2, %v1321_v11  ;;  %v2226_v11 = vld [vmem:[%s2777_s7 + $0x20] ss:$12 sps:$4 sm:$0xff]  }
 0x8a9   : > { %2132 = vmatpush3.bf16.xpose.msra.mxu0 %v1381_v50  ;;  %2133 = vmatprep.mubr.msk.bf16.mxu0 %vm2289_vm1, %v2288_v30  ;;  %v2229_v49 = vld [vmem:[%s2777_s7 + $0x34] ss:$12 sps:$4 sm:$0xff]   ;;  %v2227_v50 = vld [vmem:[%s2777_s7 + $0x30] ss:$12 sps:$4 sm:$0xff]  }
 0x8aa   : > { %1639 = vmatprep.subr.bf16.mxu0 %v2221_v45 }
 0x8ab   : > { %v1373_v51 = vpop.permute.xlu1 %1372 }
 0x8b4   : > { %2134 = vmatmul.mubr.msk.bf16.vlgmr.msra.gmra.mrb[12].mxu0 %vm503_vm2, %v1373_v51  ;;  %v2230_v51 = vld [vmem:[%s2777_s7 + $0x38] ss:$12 sps:$4 sm:$0xff]  }
 0x8b5   : > { %1671 = vmatprep.mubr.bf16.mxu0 %v2283_v8  ;;  %1640 = vmatpush1.bf16.msra.mxu0 %v2219_v46 }
 0x8b6   : > { %1641 = vmatprep.subr.bf16.mxu0 %v2225_v47 }
 0x8b9   : > { %1642 = vmatpush1.bf16.msra.mxu0 %v2223_v48 }
 0x8ba   : > { %1643 = vmatprep.subr.bf16.mxu0 %v2229_v49 }
 0x8bd   : > { %1644 = vmatpush1.bf16.msra.mxu0 %v2227_v50 }
 0x91d   : > { %v1151_v52 = vpop.xlane.xlu0 %1150 }
 0x91e   : > { %v1152_v53 = vsub.f32 %v1148_v23, %v1151_v52  ;;  %v2231_v52 = vld [vmem:[%s2777_s7 + $0x48] ss:$12 sps:$4 sm:$0xff]  }
 0x920   : > { %v1153_v54 = vmul.f32 1.442695, %v1152_v53  ;;  %v2233_v53 = vld [vmem:[%s2777_s7 + $0x4c] ss:$12 sps:$4 sm:$0xff]  }
 0x921   : > { %v1162_v55 = vpop.permute.xlu0 %1161  ;;  %1645 = vmatprep.subr.bf16.mxu0 %v2233_v53 }
 0x922   : > { %2257 = vpow2.f32 %v1153_v54  ;;  %v1167_v56 = vsel %vm616_vm3, %v1162_v55, 0  ;;  %v2234_v54 = vld [vmem:[%s2777_s7 + $0x50] ss:$12 sps:$4 sm:$0xff]   ;;  %1646 = vmatpush1.bf16.msra.mxu0 %v2231_v52 }
 0x923   : > { %2114 = vmatpush3.bf16.msra.mxu1 %v1167_v56  ;;  %1846 = vmatprep.subr.bf16.mxu0 %v2283_v8 }
 0x924   : > { %2119 = vmatprep.subr.bf16.mxu1 %v2288_v30 }
 0x92c   : > { %v2258_v58 = vpop.eup %2257 }
 0x92d   : > { %v1155_v59 = vsel %vm503_vm2, %v2258_v58, 0.0 }
 0x92e   : > { %1156 = vadd.xlane.f32.xlu1 %v1155_v59 }
 0x987   : > { %v1417_v60 = vpop.f32.mrb[12].mxu0 }
 0x988   : > { %v1423_v61 = vsel %vm447_vm4, %v1417_v60, -1e+30  ;;  %v2135_v12 = vpop.f32.mrb[13].mxu0  ;;  %v1984_v60 = vld [vmem:[%s2774_s4] ss:$0 sm:$0xff] }
 0x989   : > { %v1420_v13 = vpop.f32.mrb[14].mxu0  ;;  %v1424_v62 = vsel %vm503_vm2, %v1423_v61, -inf }
 0x98a   : > { %1425 = vmax.xlane.f32.xlu1 %v1424_v62  ;;  %v2136_v63 = vpop.f32.mrb[15].mxu0  ;;  %v2236_v62 = vld [vmem:[%s2778_s8 + $0x8] sm:$0xff]  }
 0x98b   : > { %v2237_v63 = vld [vmem:[%s2778_s8 + $0x10] sm:$0xff]  }
 0x9bb   : > { %v1157_v1 = vpop.xlane.xlu1 %1156 }
 0x9bc   : > { %2259 = vrcp.f32 %v1157_v1  ;;  %v2238_v1 = vld [vmem:[%s2778_s8 + $0x18] sm:$0xff]  }
 0x9c6   : > { %v2260_v2 = vpop.eup %2259 }
 0x9c7   : > { %v1159_v3 = vmul.f32 %v2260_v2, %v2258_v58  ;;  %v2239_v2 = vld [vmem:[%s2778_s8 + $0x20] sm:$0xff]  }
 0x9c9   : > { %v1160_v4 = vpack.c.bf16 %v1159_v3, %v1159_v3  ;;  %v2240_v3 = vld [vmem:[%s2778_s8 + $0x28] sm:$0xff]  }
 0x9cb   : > { %2116 = vmatmul.mubr.msk.bf16.vlgmr.msra.gmra.mrb[20].mxu1 %vm503_vm2, %v1160_v4  ;;  %v2241_v4 = vld [vmem:[%s2778_s8 + $0x30] sm:$0xff]  }
 0x9cc   : > { %2121 = vmatprep.mubr.msk.bf16.mxu1 %vm2289_vm1, %v2288_v30  ;;  %2120 = vmatpush3.bf16.msra.mxu1 %v2217_v6  ;;  %v2245_v6 = vld [vmem:[%s2778_s8 + $0x50] sm:$0xff]  }
 0x9cd   : > { %2137 = vmatprep.subr.bf16.mxu1 %v2288_v30 }
 0xa17   : > { %v1426_v7 = vpop.xlane.xlu1 %1425 }
 0xa18   : > { %v1427_v9 = vsub.f32 %v1423_v61, %v1426_v7  ;;  %v2242_v7 = vld [vmem:[%s2778_s8 + $0x38] sm:$0xff]  }
 0xa1a   : > { %v1428_v5 = vmul.f32 1.442695, %v1427_v9  ;;  %v2243_v9 = vld [vmem:[%s2778_s8 + $0x40] sm:$0xff]  }
 0xa1c   : > { %2261 = vpow2.f32 %v1428_v5  ;;  %v2244_v5 = vld [vmem:[%s2778_s8 + $0x48] sm:$0xff]  }
 0xa26   : > { %v2262_v10 = vpop.eup %2261 }
 0xa27   : > { %v1430_v14 = vsel %vm503_vm2, %v2262_v10, 0.0 }
 0xa28   : > { %1431 = vadd.xlane.f32.xlu1 %v1430_v14 }
 0xa39   : > { %1436 = vrot.lane.b32.xlu1 %v2457_v57, %s2292_s25  ;;  %s327_s25 = scalar_lea.vmem %s2779_s9, %s1946_s11 }
 0xa9e   : > { %v1203_v15 = vpop.f32.mrb[20].mxu1 }
 0xa9f   : > { %v1209_v16 = vpack.c.bf16 %v1203_v15, %v1203_v15  ;;  %v2117_v17 = vpop.f32.mrb[21].mxu1 }
 0xaa0   : > { %v1206_v18 = vpop.f32.mrb[22].mxu1 }
 0xaa1   : > { %v2118_v19 = vpop.f32.mrb[23].mxu1  ;;  %2122 = vmatmul.mubr.msk.bf16.vlgmr.msra.gmra.mrb[24].mxu1 %vm895_vm5, %v1209_v16 }
 0xaa2   : > { %2139 = vmatprep.mubr.msk.bf16.mxu1 %vm2289_vm1, %v2288_v30 }
 0xab5   : > { %v1432_v20 = vpop.xlane.xlu1 %1431 }
 0xab6   : > { %2263 = vrcp.f32 %v1432_v20 }
 0xab9   : > { %v1437_v21 = vpop.permute.xlu1 %1436 }
 0xaba   : > { %v1442_v22 = vsel %vm616_vm3, %v1437_v21, 0 }
 0xabb   : > { %2138 = vmatpush3.bf16.msra.mxu1 %v1442_v22 }
 0xabc   : > { %2143 = vmatprep.subr.bf16.mxu1 %v2288_v30 }
 0xac0   : > { %v2264_v24 = vpop.eup %2263 }
 0xac1   : > { %v1434_v57 = vmul.f32 %v2264_v24, %v2262_v10  ;;  %v2246_v10 = vld [vmem:[%s2778_s8 + $0x58] sm:$0xff]  }
 0xac3   : > { %v1435_v25 = vpack.c.bf16 %v1434_v57, %v1434_v57 }
 0xac5   : > { %2140 = vmatmul.mubr.msk.bf16.vlgmr.msra.gmra.mrb[28].mxu1 %vm503_vm2, %v1435_v25 }
 0xac6   : > { %2145 = vmatprep.mubr.msk.bf16.mxu1 %vm2289_vm1, %v2288_v30  ;;  %2144 = vmatpush3.bf16.msra.mxu1 %v2218_v26 }
 0xac7   : > { %2149 = vmatprep.subr.bf16.mxu1 %v2288_v30 }
 0xb74   : > { %v1256_v27 = vpop.f32.mrb[24].mxu1 }
 0xb75   : > { %v1262_v28 = vadd.f32 %v1256_v27, %v2608_v38  ;;  %v2123_v29 = vpop.f32.mrb[25].mxu1 }
 0xb76   : > { %v1259_v31 = vpop.f32.mrb[26].mxu1 }
 0xb77   : > { %v2124_v32 = vpop.f32.mrb[27].mxu1 }
 0xb98   : > { %v1478_v33 = vpop.f32.mrb[28].mxu1 }
 0xb99   : > { %v1484_v34 = vpack.c.bf16 %v1478_v33, %v1478_v33  ;;  %v2141_v35 = vpop.f32.mrb[29].mxu1 }
 0xb9a   : > { %v1481_v36 = vpop.f32.mrb[30].mxu1 }
 0xb9b   : > { %v2142_v37 = vpop.f32.mrb[31].mxu1  ;;  %2146 = vmatmul.mubr.msk.bf16.vlgmr.msra.gmra.mrb[32].mxu1 %vm895_vm5, %v1484_v34 }
 0xb9c   : > { %2157 = vmatprep.mubr.msk.bf16.mxu1 %vm2289_vm1, %v2288_v30 }
 0xc6e   : > { %v1531_v39 = vpop.f32.mrb[32].mxu1 }
 0xc6f   : > { %v1537_v40 = vadd.f32 %v1531_v39, %v1262_v28  ;;  %v2147_v41 = vpop.f32.mrb[33].mxu1 }
 0xc70   : > { %v1534_v42 = vpop.f32.mrb[34].mxu1 }
 0xc71   : > { %v2658_v23 = vadd.f32 %v1537_v40, %v2367_v0  ;;  %v2148_v38 = vpop.f32.mrb[35].mxu1  ;;  %v2222_v0 = vld [vmem:[%s2777_s7 + $0x8] ss:$12 sps:$4 sm:$0xff]  }
 0xc72   : > { %2150 = vmatpush3.bf16.msra.mxu1 %v2222_v0 }
 0xc73   : > { %v1540_v43 = vmul.f32 %v2658_v23, %v2658_v23  ;;  %2151 = vmatprep.subr.bf16.mxu1 %v2288_v30 }
 0xc75   : > { %v1541_v44 = vsel %vm332_vm0, %v1540_v43, 0.0 }
 0xc76   : > { %1542 = vadd.xlane.f32.xlu0 %v1541_v44  ;;  %2152 = vmatpush3.bf16.msra.mxu1 %v2226_v11 }
 0xc77   : > { %2153 = vmatprep.subr.bf16.mxu1 %v2288_v30 }
 0xc7a   : > { %2154 = vmatpush3.bf16.msra.mxu1 %v2230_v51 }
 0xc7b   : > { %2155 = vmatprep.subr.bf16.mxu1 %v2288_v30  ;;  %v2235_v30 = vld [vmem:[%s2778_s8] sm:$0xff]  }
 0xc7e   : > { %2156 = vmatpush3.bf16.msra.mxu1 %v2234_v54 }
 0xd03   : > { %v1543_v55 = vpop.xlane.xlu0 %1542 }
 0xd04   : > { %v1544_v56 = vmul.f32 0.015625, %v1543_v55 }
 0xd06   : > { %v1545_v58 = vadd.f32 1e-05, %v1544_v56 }
 0xd08   : > { %2265 = vrsqrt.f32 %v1545_v58 }
 0xd12   : > { %v2266_v59 = vpop.eup %2265 }
 0xd13   : > { %v1547_v61 = vmul.f32 %v2266_v59, %v2658_v23 }
 0xd15   : > { %v1554_v12 = vmul.f32 %v1984_v60, %v1547_v61 }
 0xd17   : > { %v1555_v13 = vpack.c.bf16 %v1554_v12, %v1554_v12 }
 0xd19   : > { %1997 = vmatmul.mubr.msk.bf16.vlgmr.msra.gmra.mrb[16].mxu0 %vm332_vm0, %v1555_v13  ;;  %2158 = vmatmul.mubr.msk.bf16.vlgmr.msra.gmra.mrb[36].mxu1 %vm332_vm0, %v1555_v13 }
 0xd1a   : > { %1847 = vmatpush1.bf16.msra.mxu0 %v2235_v30 }
 0xd1b   : > { %1848 = vmatprep.subr.bf16.mxu0 %v2283_v8 }
 0xd1e   : > { %1849 = vmatpush1.bf16.msra.mxu0 %v2236_v62 }
 0xd1f   : > { %1850 = vmatprep.subr.bf16.mxu0 %v2283_v8 }
 0xd22   : > { %1851 = vmatpush1.bf16.msra.mxu0 %v2237_v63 }
 0xd23   : > { %1852 = vmatprep.subr.bf16.mxu0 %v2283_v8 }
 0xd26   : > { %1853 = vmatpush1.bf16.msra.mxu0 %v2238_v1 }
 0xd27   : > { %1854 = vmatprep.subr.bf16.mxu0 %v2283_v8 }
 0xd2a   : > { %1855 = vmatpush1.bf16.msra.mxu0 %v2239_v2 }
 0xd2b   : > { %1856 = vmatprep.subr.bf16.mxu0 %v2283_v8 }
 0xd2e   : > { %1857 = vmatpush1.bf16.msra.mxu0 %v2240_v3 }
 0xd2f   : > { %1858 = vmatprep.subr.bf16.mxu0 %v2283_v8 }
 0xd32   : > { %1859 = vmatpush1.bf16.msra.mxu0 %v2241_v4 }
 0xd33   : > { %1860 = vmatprep.subr.bf16.mxu0 %v2283_v8 }
 0xd36   : > { %1861 = vmatpush1.bf16.msra.mxu0 %v2242_v7 }
 0xd37   : > { %1862 = vmatprep.subr.bf16.mxu0 %v2283_v8 }
 0xd3a   : > { %1863 = vmatpush1.bf16.msra.mxu0 %v2243_v9 }
 0xd3b   : > { %1864 = vmatprep.subr.bf16.mxu0 %v2283_v8 }
 0xd3e   : > { %1865 = vmatpush1.bf16.msra.mxu0 %v2244_v5 }
 0xd3f   : > { %1866 = vmatprep.subr.bf16.mxu0 %v2283_v8 }
 0xd42   : > { %1867 = vmatpush1.bf16.msra.mxu0 %v2245_v6 }
 0xd43   : > { %1868 = vmatprep.subr.bf16.mxu0 %v2283_v8 }
 0xd46   : > { %1869 = vmatpush1.bf16.msra.mxu0 %v2246_v10 }
 0xdec   : > { %v1673_v14 = vpop.f32.mrb[16].mxu0  ;;  %v1714_v15 = vpop.f32.mrb[36].mxu1 }
 0xded   : > { %v1675_v16 = vpop.f32.mrb[17].mxu0  ;;  %v2159_v17 = vpop.f32.mrb[37].mxu1  ;;  %v1999_v24 = vmul.f32 -1.442695, %v1673_v14 }
 0xdee   : > { %1736 = vrot.lane.b32.xlu1 %v1675_v16, %s2285_s18  ;;  %v1677_v18 = vpop.f32.mrb[18].mxu0  ;;  %v1717_v19 = vpop.f32.mrb[38].mxu1  ;;  %v2000_v22 = vmul.f32 -1.442695, %v1675_v16 }
 0xdef   : > { %v1678_v20 = vpop.f32.mrb[19].mxu0  ;;  %v2160_v21 = vpop.f32.mrb[39].mxu1 }
 0xdf0   : > { %2267 = vpow2.f32 %v2000_v22 }
 0xdf1   : > { %2269 = vpow2.f32 %v1999_v24 }
 0xdf2   : > { %1738 = vrot.lane.b32.xlu1 %v1714_v15, %s2285_s18 }
 0xdfa   : > { %v2268_v8 = vpop.eup %2267 }
 0xdfb   : > { %v2270_v57 = vpop.eup %2269  ;;  %v1727_v25 = vadd.f32 1.0, %v2268_v8 }
 0xdfc   : > { %v1726_v26 = vadd.f32 1.0, %v2270_v57 }
 0xdfd   : > { %2271 = vrcp.f32 %v1727_v25 }
 0xdfe   : > { %2273 = vrcp.f32 %v1726_v26 }
 0xe07   : > { %v2272_v27 = vpop.eup %2271 }
 0xe08   : > { %v2274_v29 = vpop.eup %2273  ;;  %v1733_v31 = vmul.f32 %v2272_v27, %v1675_v16 }
 0xe09   : > { %v1732_v32 = vmul.f32 %v2274_v29, %v1673_v14 }
 0xe60   : > { %v1737_v28 = vpop.permute.xlu1 %1736 }
 0xe64   : > { %v1739_v33 = vpop.permute.xlu1 %1738 }
 0xe65   : > { %v1740_v34 = vsel %vm332_vm0, %v1737_v28, %v1739_v33  ;;  %v1744_v35 = vmul.f32 %v1739_v33, %v1733_v31 }
 0xe66   : > { %v1743_v36 = vmul.f32 %v1740_v34, %v1732_v32 }
 0xe67   : > { %v1746_v37 = vpack.c.bf16 %v1744_v35, %v1744_v35 }
 0xe68   : > { %v1745_v39 = vpack.c.bf16 %v1743_v36, %v1743_v36 }
 0xe69   : > { %2013 = vmatprep.mubr.msk.bf16.mxu0 %vm332_vm0, %v1746_v37 }
 0xe6a   : > { %1879 = vmatmul.mubr.bf16.vlgmr.msra.gmra.mrb[20].mxu0 %v1745_v39 }
 0xf3d   : > { %v1880_v40 = vpop.f32.mrb[20].mxu0 }
 0xf3e   : > { %v1886_v41 = vadd.f32 %v1880_v40, %v2658_v23  ;;  %v1882_v42 = vpop.f32.mrb[21].mxu0 }
 0xf3f   : > { %v1883_v38 = vpop.f32.mrb[22].mxu0 }
 0xf40   : > { %1887 = vst.msk [vmem:[%s327_s25] sm:$0xff] %vm332_vm0, %v1886_v41  ;;  %v1884_v43 = vpop.f32.mrb[23].mxu0 }
 0xf41 PF: > { %s19_s30 = sadd.s32 1, %s2281_s30  }
 0xf42   : > { %p16_p4 = scmp.ge.s32.totalorder %s19_s30, 4  }
 0xf44   :  { %18 = sbr.rel (!%p16_p4) target bundleno = 1 (0x1), region = 89 }

</bundles_post_ra>
